<compile_context>
chip_gen: v5e
topology: v5e:2x2
jax: 0.10.0
libtpu: 0.0.40
codegen_flags: <defaults>
</compile_context>

<pallas_src>
import functools

import jax
import jax.numpy as jnp
from jax import lax
from jax.experimental import pallas as pl
from jax.experimental.pallas import tpu as pltpu


_VMEM_LIMIT = 32 * 1024 * 1024   # safe scoped-VMEM request on v5e / v6e / v7x
_SUB = 8                         # f32 sublane granule


def _round_up(x, m):
    return (x + m - 1) // m * m


# --------------------------- in-kernel 3x3 conv ------------------------------

def _conv3x3_flat(x, w, mask_ref, *, W, M):
    """3x3 'same' conv of row-major flattened images, spatial dim on lanes.

    x        : (Cin_p, M) f32 value; lane m = i*W + j holds pixel (i, j).
    w        : (Cout_p, 9*Cin_p) f32 value; column t*Cin_p + c is tap
               t = kh*3 + kw of input channel c.
    mask_ref : (9*Cin_p, M) VMEM ref of {0,1}; zeroes the H/W-boundary wrap
               positions of each shifted copy (zero 'same' padding).
    Returns (Cout_p, M) f32 computed as a single stacked-K MXU matmul.
    """
    pieces = []
    for kh in range(3):
        for kw in range(3):
            s = (kh - 1) * W + (kw - 1)      # want shifted[:, m] = x[:, m + s]
            if s == 0:
                pieces.append(x)
            else:
                pieces.append(pltpu.roll(x, shift=(-s) % M, axis=1))
    x9 = jnp.concatenate(pieces, axis=0) * mask_ref[...]     # (9*Cin_p, M)
    return jnp.dot(w, x9, preferred_element_type=jnp.float32)


# ------------------------------ Pallas kernels -------------------------------

def _op_norm2_kernel(x0_ref, maskc_ref, maskf_ref, wf_ref, wa_ref, o_ref,
                     *, W, M, tol, max_iter):
    """Power iteration for lip2 = ||conv||^2 = lambda_max(conv_t . conv) of one
    DFB block.  lax.while_loop => converged iterations stop doing work."""
    wf = wf_ref[...]                         # (Fp, 9*Cp)   forward taps
    wa = wa_ref[...]                         # (Cp, 9*Fp)   adjoint taps

    def cond(carry):
        k, _, _, rel_s = carry
        return jnp.logical_and(k < max_iter, rel_s >= tol)

    def body(carry):
        k, x, val11, _ = carry
        y = _conv3x3_flat(x, wf, maskc_ref, W=W, M=M)        # conv     (Fp, M)
        z = _conv3x3_flat(y, wa, maskf_ref, W=W, M=M)        # conv_t   (Cp, M)
        zz = jnp.sum(z * z, axis=1, keepdims=True)           # (Cp, 1)
        nv11 = jnp.sqrt(jnp.sum(zz, axis=0, keepdims=True))  # (1, 1)
        rel11 = jnp.abs(nv11 - val11) / val11
        new_x = z / jnp.maximum(nv11, jnp.float32(1e-30))
        rel_s = jnp.sum(rel11)               # scalar, only for the loop cond
        return (k + 1, new_x, nv11, rel_s)

    init = (jnp.int32(0), x0_ref[...],
            jnp.ones((1, 1), jnp.float32), jnp.float32(jnp.inf))
    _, _, val11, _ = lax.while_loop(cond, body, init)
    o_ref[...] = val11


def _dfbnet_fwd_kernel(l_ref, gamma_ref, maskc_ref, maskf_ref, xref_ref,
                       xin_ref, wfin_ref, wain_ref, wfb_ref, wab_ref, o_ref,
                       *, W, M, nblocks):
    """Whole DFBNet forward for one image: in_conv, all DFB blocks, out_conv.
    u / tmp stay resident in VMEM/vregs; only xref, xin and out touch HBM."""
    lam = l_ref[0]
    xref = xref_ref[...]                                          # (Cp, M)

    # u = in_conv(xin)
    u = _conv3x3_flat(xin_ref[...], wfin_ref[...], maskc_ref, W=W, M=M)

    # DFB blocks (unrolled: nblocks is small and static)
    for b in range(nblocks):
        gamma = gamma_ref[b]
        ct = _conv3x3_flat(u, wab_ref[b], maskf_ref, W=W, M=M)    # conv_t(u)
        tmp = jnp.clip(xref - ct, 0.0, 1.0)
        g1 = u + gamma * _conv3x3_flat(tmp, wfb_ref[b], maskc_ref, W=W, M=M)
        # prox: g1 - gamma*softshrink(g1/gamma, l/gamma) == clip(g1, -l, l)
        u = jnp.clip(g1, -lam, lam)

    # out = clamp(xref - out_conv(u), 0, 1), out_conv weight-tied to in_conv
    ct = _conv3x3_flat(u, wain_ref[...], maskf_ref, W=W, M=M)
    o_ref[...] = jnp.clip(xref - ct, 0.0, 1.0)


# ------------------------------- wrappers ------------------------------------

def _op_norm2_all_blocks(wf_stack, wa_stack, mask_c, mask_f, x0, *, W,
                         tol=1e-4, max_iter=300):
    """Run the power iteration for every block in one kernel (grid over blocks)."""
    B, Fp, KC = wf_stack.shape
    _, Cp, KF = wa_stack.shape
    M = mask_c.shape[1]
    out = pl.pallas_call(
        functools.partial(_op_norm2_kernel, W=W, M=M, tol=tol, max_iter=max_iter),
        out_shape=jax.ShapeDtypeStruct((B, 1, 1), jnp.float32),
        grid=(B,),
        in_specs=[
            pl.BlockSpec((Cp, M), lambda b: (0, 0)),             # x0
            pl.BlockSpec((KC, M), lambda b: (0, 0)),             # mask, Cp channels
            pl.BlockSpec((KF, M), lambda b: (0, 0)),             # mask, Fp channels
            pl.BlockSpec((None, Fp, KC), lambda b: (b, 0, 0)),   # fwd taps
            pl.BlockSpec((None, Cp, KF), lambda b: (b, 0, 0)),   # adj taps
        ],
        out_specs=pl.BlockSpec((None, 1, 1), lambda b: (b, 0, 0)),
        compiler_params=pltpu.CompilerParams(
            dimension_semantics=("parallel",),    # one block per TC on v7x
            vmem_limit_bytes=_VMEM_LIMIT),
    )(x0, mask_c, mask_f, wf_stack, wa_stack)
    return out[:, 0, 0]


def _dfbnet_fwd_call(l_arr, gammas, mask_c, mask_f, xref_p, xin_p,
                     wfin, wain, wfb, wab, *, W):
    N, Cp, M = xref_p.shape
    B, Fp, KC = wfb.shape
    KF = wab.shape[2]
    return pl.pallas_call(
        functools.partial(_dfbnet_fwd_kernel, W=W, M=M, nblocks=B),
        out_shape=jax.ShapeDtypeStruct((N, Cp, M), jnp.float32),
        grid=(N,),
        in_specs=[
            pl.BlockSpec(memory_space=pltpu.MemorySpace.SMEM),   # l
            pl.BlockSpec(memory_space=pltpu.MemorySpace.SMEM),   # gamma per block
            pl.BlockSpec((9 * Cp, M), lambda n: (0, 0)),         # mask_c
            pl.BlockSpec((9 * Fp, M), lambda n: (0, 0)),         # mask_f
            pl.BlockSpec((None, Cp, M), lambda n: (n, 0, 0)),    # xref
            pl.BlockSpec((None, Cp, M), lambda n: (n, 0, 0)),    # xin
            pl.BlockSpec((Fp, KC), lambda n: (0, 0)),            # in_conv fwd taps
            pl.BlockSpec((Cp, KF), lambda n: (0, 0)),            # out_conv adj taps
            pl.BlockSpec((B, Fp, KC), lambda n: (0, 0, 0)),      # block fwd taps
            pl.BlockSpec((B, Cp, KF), lambda n: (0, 0, 0)),      # block adj taps
        ],
        out_specs=pl.BlockSpec((None, Cp, M), lambda n: (n, 0, 0)),
        compiler_params=pltpu.CompilerParams(
            dimension_semantics=("parallel",),    # batch across v7x TCs
            vmem_limit_bytes=_VMEM_LIMIT),
    )(l_arr, gammas, mask_c, mask_f, xref_p, xin_p, wfin, wain, wfb, wab)


# ------------------------------ host-side glue -------------------------------

def _fwd_taps(w, Cp, Fp):
    """Conv2d weight (F, C, 3, 3) -> (Fp, 9*Cp) matmul operand.  Column
    t*Cp + c (t = kh*3 + kw) holds w[:, c, kh, kw]; padded rows/cols are 0."""
    F, C = w.shape[0], w.shape[1]
    wt = jnp.transpose(w, (0, 2, 3, 1))                       # (F, 3, 3, C)
    wt = jnp.pad(wt, ((0, Fp - F), (0, 0), (0, 0), (0, Cp - C)))
    return wt.reshape(Fp, 9 * Cp).astype(jnp.float32)


def _adj_taps(w, Cp, Fp):
    """Weight-tied ConvTranspose2d (adjoint) expressed as a forward conv with
    the 180-degree-flipped kernel: (F, C, 3, 3) -> (Cp, 9*Fp)."""
    F, C = w.shape[0], w.shape[1]
    wflip = w[:, :, ::-1, ::-1]
    wt = jnp.transpose(wflip, (1, 2, 3, 0))                   # (C, 3, 3, F)
    wt = jnp.pad(wt, ((0, Cp - C), (0, 0), (0, 0), (0, Fp - F)))
    return wt.reshape(Cp, 9 * Fp).astype(jnp.float32)


def _tap_masks(H, W, reps):
    """(9*reps, H*W) {0,1} mask: tap t = kh*3+kw of output pixel (i, j) is
    valid iff (i+kh-1, j+kw-1) lies inside the HxW image ('same' zero pad)."""
    M = H * W
    ii = jnp.arange(M, dtype=jnp.int32) // W
    jj = jnp.arange(M, dtype=jnp.int32) % W
    rows = []
    for kh in range(3):
        for kw in range(3):
            r, c = ii + (kh - 1), jj + (kw - 1)
            rows.append(((r >= 0) & (r < H) & (c >= 0) & (c < W))
                        .astype(jnp.float32))
    return jnp.repeat(jnp.stack(rows), reps, axis=0)          # (9*reps, M)


def _pack_nchw(x, Cp):
    """(N, C, H, W) -> lane-dense (N, Cp, H*W) with zero-padded channels."""
    N, C, H, W = x.shape
    x = x.reshape(N, C, H * W).astype(jnp.float32)
    return jnp.pad(x, ((0, 0), (0, Cp - C), (0, 0)))


def compute_block_lip2(w_blocks, *, C, H, W, tol=1e-4, max_iter=300):
    """lip2 = ||conv||^2 per DFB block (power iteration, all blocks in one
    pallas_call).  Depends only on the weights -> cache/hoist it out of the
    forward (pass lip2=) when the weights are fixed."""
    F = w_blocks[0].shape[0]
    Cp, Fp = _round_up(C, _SUB), _round_up(F, _SUB)
    M = H * W
    mask_c, mask_f = _tap_masks(H, W, Cp), _tap_masks(H, W, Fp)
    wfb = jnp.stack([_fwd_taps(w, Cp, Fp) for w in w_blocks])
    wab = jnp.stack([_adj_taps(w, Cp, Fp) for w in w_blocks])
    # TODO(synk): the reference seeds the power iteration with torch.randn and
    # warm-starts it across calls (self.xlip2); a fixed JAX key is used here —
    # the converged spectral norm is the same.
    x0 = jax.random.normal(jax.random.PRNGKey(1234), (C, M), jnp.float32)
    x0 = x0 / jnp.sqrt(jnp.sum(x0 * x0))
    x0 = jnp.pad(x0, ((0, Cp - C), (0, 0)))
    return _op_norm2_all_blocks(wfb, wab, mask_c, mask_f, x0, W=W,
                                tol=tol, max_iter=max_iter)


def dfbnet_forward(xref, xin, l, w_in, w_blocks, lip2=None):
    """Training-mode forward of DFBNet.

    xref, xin : (N, C, H, W) float32 (NCHW, like the PyTorch reference)
    l         : threshold parameter (scalar)
    w_in      : (F, C, 3, 3) in_conv / out_conv (weight-tied) filter
    w_blocks  : tuple of per-block (F, C, 3, 3) filters
    lip2      : optional precomputed (num_blocks,) ||conv||^2 values; if None
                they are recomputed by power iteration (eval=False behaviour).
    """
    N, C, H, W = xref.shape
    F = w_in.shape[0]
    nblocks = len(w_blocks)
    assert nblocks >= 1, "need at least one DFB block"
    Cp, Fp = _round_up(C, _SUB), _round_up(F, _SUB)

    mask_c, mask_f = _tap_masks(H, W, Cp), _tap_masks(H, W, Fp)
    wfin, wain = _fwd_taps(w_in, Cp, Fp), _adj_taps(w_in, Cp, Fp)
    wfb = jnp.stack([_fwd_taps(w, Cp, Fp) for w in w_blocks])
    wab = jnp.stack([_adj_taps(w, Cp, Fp) for w in w_blocks])

    if lip2 is None:       # eval=False: recompute ||conv||^2 for every block
        lip2 = compute_block_lip2(w_blocks, C=C, H=H, W=W)
    gammas = (1.8 / lip2).astype(jnp.float32)
    l_arr = jnp.reshape(jnp.asarray(l, jnp.float32), (1,))

    out_p = _dfbnet_fwd_call(l_arr, gammas, mask_c, mask_f,
                             _pack_nchw(xref, Cp), _pack_nchw(xin, Cp),
                             wfin, wain, wfb, wab, W=W)
    return out_p[:, :C, :].reshape(N, C, H, W)


# -------------------------- pure-JAX reference check -------------------------

def _ref_forward(xref, xin, l, w_in, w_blocks, lip2):
    """Pure-JAX (XLA conv) reference of the PyTorch module; reuses the
    kernel-computed lip2 so only the conv / prox math is compared."""
    conv = lambda x, w: lax.conv_general_dilated(
        x, w, (1, 1), ((1, 1), (1, 1)),
        dimension_numbers=("NCHW", "OIHW", "NCHW"),
        precision=lax.Precision.HIGHEST)

    def conv_t(u, w):      # weight-tied ConvTranspose2d, padding=1
        wa = jnp.transpose(w[:, :, ::-1, ::-1], (1, 0, 2, 3))
        return conv(u, wa)

    def softshrink(z, lambd):
        return jnp.where(z > lambd, z - lambd,
                         jnp.where(z < -lambd, z + lambd, 0.0))

    u = conv(xin, w_in)
    for i, w in enumerate(w_blocks):
        gamma = 1.8 / lip2[i]
        tmp = jnp.clip(xref - conv_t(u, w), 0.0, 1.0)
        g1 = u + gamma * conv(tmp, w)
        u = g1 - gamma * softshrink(g1 / gamma, l / gamma)
    return jnp.clip(xref - conv_t(u, w_in), 0.0, 1.0)


# ----------------------------------- main ------------------------------------

if __name__ == "__main__":
    key = jax.random.PRNGKey(0)
    N, C, H, W = 2, 3, 16, 16      # batch, channels, spatial
    F = 8                          # features in the transformed domain
    num_of_layers = 4              # -> num_of_layers - 2 = 2 DFB blocks
    l = 0.05                       # threshold parameter

    k_x, k_win, k_blk = jax.random.split(key, 3)
    xref = jax.random.uniform(k_x, (N, C, H, W), dtype=jnp.float32)
    xin = xref

    scale = 1.0 / jnp.sqrt(9.0 * C)
    w_in = scale * jax.random.normal(k_win, (F, C, 3, 3), dtype=jnp.float32)
    wkeys = jax.random.split(k_blk, num_of_layers - 2)
    w_blocks = tuple(scale * jax.random.normal(wk, (F, C, 3, 3), jnp.float32)
                     for wk in wkeys)

    fwd = jax.jit(dfbnet_forward)
    out = fwd(xref, xin, l, w_in, w_blocks)
    jax.block_until_ready(out)
    assert out.shape == (N, C, H, W)
    assert bool(jnp.all(jnp.isfinite(out)))

    # Numerical check against a pure-JAX (XLA conv) reference, using the same
    # lip2 values the kernel path computes (power iteration is deterministic).
    lip2 = jax.jit(functools.partial(compute_block_lip2, C=C, H=H, W=W))(w_blocks)
    ref = _ref_forward(xref, xin, l, w_in, w_blocks, lip2)
    max_err = float(jnp.max(jnp.abs(out - ref)))
    assert max_err < 2e-3, f"mismatch vs reference: max abs err = {max_err}"

    print("KERNEL_OK")
</pallas_src>

<mosaic_0001>
module attributes {stable_mosaic.version = 11 : i64} {
  func.func @_op_norm2_kernel(%arg0: i32, %arg1: memref<8x256xf32, #tpu.memory_space<vmem>>, %arg2: memref<72x256xf32, #tpu.memory_space<vmem>>, %arg3: memref<72x256xf32, #tpu.memory_space<vmem>>, %arg4: memref<1x8x72xf32, #tpu.memory_space<vmem>>, %arg5: memref<1x8x72xf32, #tpu.memory_space<vmem>>, %arg6: memref<1x1x1xf32, #tpu.memory_space<vmem>>) attributes {dimension_semantics = [#tpu.dimension_semantics<parallel>], iteration_bounds = array<i64: 2>, scalar_prefetch = 0 : i64, scratch_operands = 0 : i64, tpu.core_type = #tpu.core_type<tc>, window_params = [{pipeline_mode = #tpu.pipeline_mode<synchronous>, transform_indices = @transform_0, window_bounds = array<i64: 8, 256>}, {pipeline_mode = #tpu.pipeline_mode<synchronous>, transform_indices = @transform_1, window_bounds = array<i64: 72, 256>}, {pipeline_mode = #tpu.pipeline_mode<synchronous>, transform_indices = @transform_2, window_bounds = array<i64: 72, 256>}, {transform_indices = @transform_3, window_bounds = array<i64: 1, 8, 72>}, {transform_indices = @transform_4, window_bounds = array<i64: 1, 8, 72>}, {transform_indices = @transform_5, window_bounds = array<i64: 1, 1, 1>}]} {
    %c0 = arith.constant 0 : index
    %c0_0 = arith.constant 0 : index
    %c0_1 = arith.constant 0 : index
    %0 = vector.load %arg4[%c0, %c0_0, %c0_1] : memref<1x8x72xf32, #tpu.memory_space<vmem>>, vector<1x8x72xf32>
    %1 = vector.shape_cast %0 : vector<1x8x72xf32> to vector<8x72xf32>
    %c0_2 = arith.constant 0 : index
    %c0_3 = arith.constant 0 : index
    %c0_4 = arith.constant 0 : index
    %2 = vector.load %arg5[%c0_2, %c0_3, %c0_4] : memref<1x8x72xf32, #tpu.memory_space<vmem>>, vector<1x8x72xf32>
    %3 = vector.shape_cast %2 : vector<1x8x72xf32> to vector<8x72xf32>
    %c0_5 = arith.constant 0 : index
    %c0_6 = arith.constant 0 : index
    %4 = vector.load %arg1[%c0_5, %c0_6] : memref<8x256xf32, #tpu.memory_space<vmem>>, vector<8x256xf32>
    %cst = arith.constant 1.000000e+00 : f32
    %5 = vector.broadcast %cst : f32 to vector<1x1xf32>
    %c0_i32 = arith.constant 0 : i32
    %cst_7 = arith.constant 0x7F800000 : f32
    %6:4 = scf.while (%arg7 = %c0_i32, %arg8 = %4, %arg9 = %5, %arg10 = %cst_7) : (i32, vector<8x256xf32>, vector<1x1xf32>, f32) -> (i32, vector<8x256xf32>, vector<1x1xf32>, f32) {
      %c300_i32 = arith.constant 300 : i32
      %10 = arith.cmpi slt, %arg7, %c300_i32 : i32
      %cst_11 = arith.constant 9.99999974E-5 : f32
      %11 = arith.cmpf oge, %arg10, %cst_11 : f32
      %12 = arith.andi %10, %11 : i1
      scf.condition(%12) %arg7, %arg8, %arg9, %arg10 : i32, vector<8x256xf32>, vector<1x1xf32>, f32
    } do {
    ^bb0(%arg7: i32, %arg8: vector<8x256xf32>, %arg9: vector<1x1xf32>, %arg10: f32):
      %c17_i32 = arith.constant 17 : i32
      %10 = tpu.dynamic_rotate %arg8 by %c17_i32 dim 1 : vector<8x256xf32>, i32 -> vector<8x256xf32>
      %c16_i32 = arith.constant 16 : i32
      %11 = tpu.dynamic_rotate %arg8 by %c16_i32 dim 1 : vector<8x256xf32>, i32 -> vector<8x256xf32>
      %c15_i32 = arith.constant 15 : i32
      %12 = tpu.dynamic_rotate %arg8 by %c15_i32 dim 1 : vector<8x256xf32>, i32 -> vector<8x256xf32>
      %c1_i32 = arith.constant 1 : i32
      %13 = tpu.dynamic_rotate %arg8 by %c1_i32 dim 1 : vector<8x256xf32>, i32 -> vector<8x256xf32>
      %c255_i32 = arith.constant 255 : i32
      %14 = tpu.dynamic_rotate %arg8 by %c255_i32 dim 1 : vector<8x256xf32>, i32 -> vector<8x256xf32>
      %c241_i32 = arith.constant 241 : i32
      %15 = tpu.dynamic_rotate %arg8 by %c241_i32 dim 1 : vector<8x256xf32>, i32 -> vector<8x256xf32>
      %c240_i32 = arith.constant 240 : i32
      %16 = tpu.dynamic_rotate %arg8 by %c240_i32 dim 1 : vector<8x256xf32>, i32 -> vector<8x256xf32>
      %c239_i32 = arith.constant 239 : i32
      %17 = tpu.dynamic_rotate %arg8 by %c239_i32 dim 1 : vector<8x256xf32>, i32 -> vector<8x256xf32>
      %18 = tpu.concatenate %10, %11, %12, %13, %arg8, %14, %15, %16, %17 in 0 : vector<8x256xf32>, vector<8x256xf32>, vector<8x256xf32>, vector<8x256xf32>, vector<8x256xf32>, vector<8x256xf32>, vector<8x256xf32>, vector<8x256xf32>, vector<8x256xf32> -> vector<72x256xf32>
      %c0_11 = arith.constant 0 : index
      %c0_12 = arith.constant 0 : index
      %19 = vector.load %arg2[%c0_11, %c0_12] : memref<72x256xf32, #tpu.memory_space<vmem>>, vector<72x256xf32>
      %20 = arith.mulf %18, %19 : vector<72x256xf32>
      %cst_13 = arith.constant dense<0.000000e+00> : vector<8x256xf32>
      %21 = tpu.matmul %1, %20, %cst_13 {dimension_numbers = #tpu.dot_dimension_numbers<[1], [0], [0], [1], [0, 0, 1, 1], [], []>} : vector<8x72xf32>, vector<72x256xf32>, vector<8x256xf32> -> vector<8x256xf32>
      %c17_i32_14 = arith.constant 17 : i32
      %22 = tpu.dynamic_rotate %21 by %c17_i32_14 dim 1 : vector<8x256xf32>, i32 -> vector<8x256xf32>
      %c16_i32_15 = arith.constant 16 : i32
      %23 = tpu.dynamic_rotate %21 by %c16_i32_15 dim 1 : vector<8x256xf32>, i32 -> vector<8x256xf32>
      %c15_i32_16 = arith.constant 15 : i32
      %24 = tpu.dynamic_rotate %21 by %c15_i32_16 dim 1 : vector<8x256xf32>, i32 -> vector<8x256xf32>
      %c1_i32_17 = arith.constant 1 : i32
      %25 = tpu.dynamic_rotate %21 by %c1_i32_17 dim 1 : vector<8x256xf32>, i32 -> vector<8x256xf32>
      %c255_i32_18 = arith.constant 255 : i32
      %26 = tpu.dynamic_rotate %21 by %c255_i32_18 dim 1 : vector<8x256xf32>, i32 -> vector<8x256xf32>
      %c241_i32_19 = arith.constant 241 : i32
      %27 = tpu.dynamic_rotate %21 by %c241_i32_19 dim 1 : vector<8x256xf32>, i32 -> vector<8x256xf32>
      %c240_i32_20 = arith.constant 240 : i32
      %28 = tpu.dynamic_rotate %21 by %c240_i32_20 dim 1 : vector<8x256xf32>, i32 -> vector<8x256xf32>
      %c239_i32_21 = arith.constant 239 : i32
      %29 = tpu.dynamic_rotate %21 by %c239_i32_21 dim 1 : vector<8x256xf32>, i32 -> vector<8x256xf32>
      %30 = tpu.concatenate %22, %23, %24, %25, %21, %26, %27, %28, %29 in 0 : vector<8x256xf32>, vector<8x256xf32>, vector<8x256xf32>, vector<8x256xf32>, vector<8x256xf32>, vector<8x256xf32>, vector<8x256xf32>, vector<8x256xf32>, vector<8x256xf32> -> vector<72x256xf32>
      %c0_22 = arith.constant 0 : index
      %c0_23 = arith.constant 0 : index
      %31 = vector.load %arg3[%c0_22, %c0_23] : memref<72x256xf32, #tpu.memory_space<vmem>>, vector<72x256xf32>
      %32 = arith.mulf %30, %31 : vector<72x256xf32>
      %cst_24 = arith.constant dense<0.000000e+00> : vector<8x256xf32>
      %33 = tpu.matmul %3, %32, %cst_24 {dimension_numbers = #tpu.dot_dimension_numbers<[1], [0], [0], [1], [0, 0, 1, 1], [], []>} : vector<8x72xf32>, vector<72x256xf32>, vector<8x256xf32> -> vector<8x256xf32>
      %34 = arith.mulf %33, %33 : vector<8x256xf32>
      %cst_25 = arith.constant dense<0.000000e+00> : vector<8xf32>
      %35 = vector.multi_reduction <add>, %34, %cst_25 [1] : vector<8x256xf32> to vector<8xf32>
      %36 = vector.shape_cast %35 : vector<8xf32> to vector<8x1xf32>
      %cst_26 = arith.constant dense<0.000000e+00> : vector<1xf32>
      %37 = vector.multi_reduction <add>, %36, %cst_26 [0] : vector<8x1xf32> to vector<1xf32>
      %38 = vector.shape_cast %37 : vector<1xf32> to vector<1x1xf32>
      %39 = math.sqrt %38 : vector<1x1xf32>
      %40 = arith.subf %39, %arg9 : vector<1x1xf32>
      %41 = math.absf %40 : vector<1x1xf32>
      %42 = arith.divf %41, %arg9 : vector<1x1xf32>
      %cst_27 = arith.constant 1.000000e-30 : f32
      %43 = vector.broadcast %cst_27 : f32 to vector<1x1xf32>
      %44 = arith.maximumf %39, %43 : vector<1x1xf32>
      %45 = vector.broadcast %44 : vector<1x1xf32> to vector<8x256xf32>
      %46 = arith.divf %33, %45 : vector<8x256xf32>
      %47 = vector.shape_cast %42 : vector<1x1xf32> to vector<1x1x1xf32>
      %cst_28 = arith.constant dense<0.000000e+00> : vector<1xf32>
      %48 = vector.multi_reduction <add>, %47, %cst_28 [1, 2] : vector<1x1x1xf32> to vector<1xf32>
      %49 = vector.shape_cast %48 : vector<1xf32> to vector<1x1x1xf32>
      %50 = vector.extract %49[0, 0, 0] : f32 from vector<1x1x1xf32>
      %c1_i32_29 = arith.constant 1 : i32
      %51 = arith.addi %arg7, %c1_i32_29 : i32
      scf.yield %51, %46, %39, %50 : i32, vector<8x256xf32>, vector<1x1xf32>, f32
    }
    %c0_8 = arith.constant 0 : index
    %c0_9 = arith.constant 0 : index
    %c0_10 = arith.constant 0 : index
    %7 = vector.load %arg6[%c0_8, %c0_9, %c0_10] : memref<1x1x1xf32, #tpu.memory_space<vmem>>, vector<1x1x1xf32>
    %8 = vector.shape_cast %7 : vector<1x1x1xf32> to vector<1x1xf32>
    %9 = vector.shape_cast %6#2 : vector<1x1xf32> to vector<1x1x1xf32>
    tpu.vector_store %arg6[%c0_8, %c0_9, %c0_10], %9 {strides = array<i32>} : memref<1x1x1xf32, #tpu.memory_space<vmem>>, vector<1x1x1xf32>,
    return
  }
  func.func @transform_0(%arg0: i32) -> (i32, i32) {
    %c0_i32 = arith.constant 0 : i32
    %c0_i32_0 = arith.constant 0 : i32
    %c0_i32_1 = arith.constant 0 : i32
    return %c0_i32, %c0_i32_0 : i32, i32
  }
  func.func @transform_1(%arg0: i32) -> (i32, i32) {
    %c0_i32 = arith.constant 0 : i32
    %c0_i32_0 = arith.constant 0 : i32
    %c0_i32_1 = arith.constant 0 : i32
    return %c0_i32, %c0_i32_0 : i32, i32
  }
  func.func @transform_2(%arg0: i32) -> (i32, i32) {
    %c0_i32 = arith.constant 0 : i32
    %c0_i32_0 = arith.constant 0 : i32
    %c0_i32_1 = arith.constant 0 : i32
    return %c0_i32, %c0_i32_0 : i32, i32
  }
  func.func @transform_3(%arg0: i32) -> (i32, i32, i32) {
    %c0_i32 = arith.constant 0 : i32
    %c0_i32_0 = arith.constant 0 : i32
    %c0_i32_1 = arith.constant 0 : i32
    return %arg0, %c0_i32, %c0_i32_0 : i32, i32, i32
  }
  func.func @transform_4(%arg0: i32) -> (i32, i32, i32) {
    %c0_i32 = arith.constant 0 : i32
    %c0_i32_0 = arith.constant 0 : i32
    %c0_i32_1 = arith.constant 0 : i32
    return %arg0, %c0_i32, %c0_i32_0 : i32, i32, i32
  }
  func.func @transform_5(%arg0: i32) -> (i32, i32, i32) {
    %c0_i32 = arith.constant 0 : i32
    %c0_i32_0 = arith.constant 0 : i32
    %c0_i32_1 = arith.constant 0 : i32
    return %arg0, %c0_i32, %c0_i32_0 : i32, i32, i32
  }
}

module attributes {stable_mosaic.version = 11 : i64} {
  func.func @_dfbnet_fwd_kernel(%arg0: i32, %arg1: memref<1xf32, #tpu.memory_space<smem>>, %arg2: memref<2xf32, #tpu.memory_space<smem>>, %arg3: memref<72x256xf32, #tpu.memory_space<vmem>>, %arg4: memref<72x256xf32, #tpu.memory_space<vmem>>, %arg5: memref<1x8x256xf32, #tpu.memory_space<vmem>>, %arg6: memref<1x8x256xf32, #tpu.memory_space<vmem>>, %arg7: memref<8x72xf32, #tpu.memory_space<vmem>>, %arg8: memref<8x72xf32, #tpu.memory_space<vmem>>, %arg9: memref<2x8x72xf32, #tpu.memory_space<vmem>>, %arg10: memref<2x8x72xf32, #tpu.memory_space<vmem>>, %arg11: memref<1x8x256xf32, #tpu.memory_space<vmem>>) attributes {dimension_semantics = [#tpu.dimension_semantics<parallel>], iteration_bounds = array<i64: 2>, scalar_prefetch = 0 : i64, scratch_operands = 0 : i64, tpu.core_type = #tpu.core_type<tc>, window_params = [{transform_indices = @transform_0, window_bounds = array<i64: 1>}, {transform_indices = @transform_1, window_bounds = array<i64: 2>}, {pipeline_mode = #tpu.pipeline_mode<synchronous>, transform_indices = @transform_2, window_bounds = array<i64: 72, 256>}, {pipeline_mode = #tpu.pipeline_mode<synchronous>, transform_indices = @transform_3, window_bounds = array<i64: 72, 256>}, {transform_indices = @transform_4, window_bounds = array<i64: 1, 8, 256>}, {transform_indices = @transform_5, window_bounds = array<i64: 1, 8, 256>}, {pipeline_mode = #tpu.pipeline_mode<synchronous>, transform_indices = @transform_6, window_bounds = array<i64: 8, 72>}, {pipeline_mode = #tpu.pipeline_mode<synchronous>, transform_indices = @transform_7, window_bounds = array<i64: 8, 72>}, {pipeline_mode = #tpu.pipeline_mode<synchronous>, transform_indices = @transform_8, window_bounds = array<i64: 2, 8, 72>}, {pipeline_mode = #tpu.pipeline_mode<synchronous>, transform_indices = @transform_9, window_bounds = array<i64: 2, 8, 72>}, {transform_indices = @transform_10, window_bounds = array<i64: 1, 8, 256>}]} {
    %c0 = arith.constant 0 : index
    %0 = memref.load %arg1[%c0] : memref<1xf32, #tpu.memory_space<smem>>
    %c0_0 = arith.constant 0 : index
    %c0_1 = arith.constant 0 : index
    %c0_2 = arith.constant 0 : index
    %1 = vector.load %arg5[%c0_0, %c0_1, %c0_2] : memref<1x8x256xf32, #tpu.memory_space<vmem>>, vector<1x8x256xf32>
    %2 = vector.shape_cast %1 : vector<1x8x256xf32> to vector<8x256xf32>
    %c0_3 = arith.constant 0 : index
    %c0_4 = arith.constant 0 : index
    %c0_5 = arith.constant 0 : index
    %3 = vector.load %arg6[%c0_3, %c0_4, %c0_5] : memref<1x8x256xf32, #tpu.memory_space<vmem>>, vector<1x8x256xf32>
    %4 = vector.shape_cast %3 : vector<1x8x256xf32> to vector<8x256xf32>
    %c0_6 = arith.constant 0 : index
    %c0_7 = arith.constant 0 : index
    %5 = vector.load %arg7[%c0_6, %c0_7] : memref<8x72xf32, #tpu.memory_space<vmem>>, vector<8x72xf32>
    %c17_i32 = arith.constant 17 : i32
    %6 = tpu.dynamic_rotate %4 by %c17_i32 dim 1 : vector<8x256xf32>, i32 -> vector<8x256xf32>
    %c16_i32 = arith.constant 16 : i32
    %7 = tpu.dynamic_rotate %4 by %c16_i32 dim 1 : vector<8x256xf32>, i32 -> vector<8x256xf32>
    %c15_i32 = arith.constant 15 : i32
    %8 = tpu.dynamic_rotate %4 by %c15_i32 dim 1 : vector<8x256xf32>, i32 -> vector<8x256xf32>
    %c1_i32 = arith.constant 1 : i32
    %9 = tpu.dynamic_rotate %4 by %c1_i32 dim 1 : vector<8x256xf32>, i32 -> vector<8x256xf32>
    %c255_i32 = arith.constant 255 : i32
    %10 = tpu.dynamic_rotate %4 by %c255_i32 dim 1 : vector<8x256xf32>, i32 -> vector<8x256xf32>
    %c241_i32 = arith.constant 241 : i32
    %11 = tpu.dynamic_rotate %4 by %c241_i32 dim 1 : vector<8x256xf32>, i32 -> vector<8x256xf32>
    %c240_i32 = arith.constant 240 : i32
    %12 = tpu.dynamic_rotate %4 by %c240_i32 dim 1 : vector<8x256xf32>, i32 -> vector<8x256xf32>
    %c239_i32 = arith.constant 239 : i32
    %13 = tpu.dynamic_rotate %4 by %c239_i32 dim 1 : vector<8x256xf32>, i32 -> vector<8x256xf32>
    %14 = tpu.concatenate %6, %7, %8, %9, %4, %10, %11, %12, %13 in 0 : vector<8x256xf32>, vector<8x256xf32>, vector<8x256xf32>, vector<8x256xf32>, vector<8x256xf32>, vector<8x256xf32>, vector<8x256xf32>, vector<8x256xf32>, vector<8x256xf32> -> vector<72x256xf32>
    %c0_8 = arith.constant 0 : index
    %c0_9 = arith.constant 0 : index
    %15 = vector.load %arg3[%c0_8, %c0_9] : memref<72x256xf32, #tpu.memory_space<vmem>>, vector<72x256xf32>
    %16 = arith.mulf %14, %15 : vector<72x256xf32>
    %cst = arith.constant dense<0.000000e+00> : vector<8x256xf32>
    %17 = tpu.matmul %5, %16, %cst {dimension_numbers = #tpu.dot_dimension_numbers<[1], [0], [0], [1], [0, 0, 1, 1], [], []>} : vector<8x72xf32>, vector<72x256xf32>, vector<8x256xf32> -> vector<8x256xf32>
    %c0_10 = arith.constant 0 : index
    %18 = memref.load %arg2[%c0_10] : memref<2xf32, #tpu.memory_space<smem>>
    %c0_11 = arith.constant 0 : index
    %c0_12 = arith.constant 0 : index
    %c0_13 = arith.constant 0 : index
    %19 = vector.load %arg10[%c0_11, %c0_12, %c0_13] : memref<2x8x72xf32, #tpu.memory_space<vmem>>, vector<1x8x72xf32>
    %20 = vector.shape_cast %19 : vector<1x8x72xf32> to vector<8x72xf32>
    %c17_i32_14 = arith.constant 17 : i32
    %21 = tpu.dynamic_rotate %17 by %c17_i32_14 dim 1 : vector<8x256xf32>, i32 -> vector<8x256xf32>
    %c16_i32_15 = arith.constant 16 : i32
    %22 = tpu.dynamic_rotate %17 by %c16_i32_15 dim 1 : vector<8x256xf32>, i32 -> vector<8x256xf32>
    %c15_i32_16 = arith.constant 15 : i32
    %23 = tpu.dynamic_rotate %17 by %c15_i32_16 dim 1 : vector<8x256xf32>, i32 -> vector<8x256xf32>
    %c1_i32_17 = arith.constant 1 : i32
    %24 = tpu.dynamic_rotate %17 by %c1_i32_17 dim 1 : vector<8x256xf32>, i32 -> vector<8x256xf32>
    %c255_i32_18 = arith.constant 255 : i32
    %25 = tpu.dynamic_rotate %17 by %c255_i32_18 dim 1 : vector<8x256xf32>, i32 -> vector<8x256xf32>
    %c241_i32_19 = arith.constant 241 : i32
    %26 = tpu.dynamic_rotate %17 by %c241_i32_19 dim 1 : vector<8x256xf32>, i32 -> vector<8x256xf32>
    %c240_i32_20 = arith.constant 240 : i32
    %27 = tpu.dynamic_rotate %17 by %c240_i32_20 dim 1 : vector<8x256xf32>, i32 -> vector<8x256xf32>
    %c239_i32_21 = arith.constant 239 : i32
    %28 = tpu.dynamic_rotate %17 by %c239_i32_21 dim 1 : vector<8x256xf32>, i32 -> vector<8x256xf32>
    %29 = tpu.concatenate %21, %22, %23, %24, %17, %25, %26, %27, %28 in 0 : vector<8x256xf32>, vector<8x256xf32>, vector<8x256xf32>, vector<8x256xf32>, vector<8x256xf32>, vector<8x256xf32>, vector<8x256xf32>, vector<8x256xf32>, vector<8x256xf32> -> vector<72x256xf32>
    %c0_22 = arith.constant 0 : index
    %c0_23 = arith.constant 0 : index
    %30 = vector.load %arg4[%c0_22, %c0_23] : memref<72x256xf32, #tpu.memory_space<vmem>>, vector<72x256xf32>
    %31 = arith.mulf %29, %30 : vector<72x256xf32>
    %cst_24 = arith.constant dense<0.000000e+00> : vector<8x256xf32>
    %32 = tpu.matmul %20, %31, %cst_24 {dimension_numbers = #tpu.dot_dimension_numbers<[1], [0], [0], [1], [0, 0, 1, 1], [], []>} : vector<8x72xf32>, vector<72x256xf32>, vector<8x256xf32> -> vector<8x256xf32>
    %33 = arith.subf %2, %32 : vector<8x256xf32>
    %cst_25 = arith.constant 0.000000e+00 : f32
    %cst_26 = arith.constant 1.000000e+00 : f32
    %34 = vector.broadcast %cst_25 : f32 to vector<8x256xf32>
    %35 = arith.maximumf %34, %33 : vector<8x256xf32>
    %36 = vector.broadcast %cst_26 : f32 to vector<8x256xf32>
    %37 = arith.minimumf %36, %35 : vector<8x256xf32>
    %c0_27 = arith.constant 0 : index
    %c0_28 = arith.constant 0 : index
    %c0_29 = arith.constant 0 : index
    %38 = vector.load %arg9[%c0_27, %c0_28, %c0_29] : memref<2x8x72xf32, #tpu.memory_space<vmem>>, vector<1x8x72xf32>
    %39 = vector.shape_cast %38 : vector<1x8x72xf32> to vector<8x72xf32>
    %c17_i32_30 = arith.constant 17 : i32
    %40 = tpu.dynamic_rotate %37 by %c17_i32_30 dim 1 : vector<8x256xf32>, i32 -> vector<8x256xf32>
    %c16_i32_31 = arith.constant 16 : i32
    %41 = tpu.dynamic_rotate %37 by %c16_i32_31 dim 1 : vector<8x256xf32>, i32 -> vector<8x256xf32>
    %c15_i32_32 = arith.constant 15 : i32
    %42 = tpu.dynamic_rotate %37 by %c15_i32_32 dim 1 : vector<8x256xf32>, i32 -> vector<8x256xf32>
    %c1_i32_33 = arith.constant 1 : i32
    %43 = tpu.dynamic_rotate %37 by %c1_i32_33 dim 1 : vector<8x256xf32>, i32 -> vector<8x256xf32>
    %c255_i32_34 = arith.constant 255 : i32
    %44 = tpu.dynamic_rotate %37 by %c255_i32_34 dim 1 : vector<8x256xf32>, i32 -> vector<8x256xf32>
    %c241_i32_35 = arith.constant 241 : i32
    %45 = tpu.dynamic_rotate %37 by %c241_i32_35 dim 1 : vector<8x256xf32>, i32 -> vector<8x256xf32>
    %c240_i32_36 = arith.constant 240 : i32
    %46 = tpu.dynamic_rotate %37 by %c240_i32_36 dim 1 : vector<8x256xf32>, i32 -> vector<8x256xf32>
    %c239_i32_37 = arith.constant 239 : i32
    %47 = tpu.dynamic_rotate %37 by %c239_i32_37 dim 1 : vector<8x256xf32>, i32 -> vector<8x256xf32>
    %48 = tpu.concatenate %40, %41, %42, %43, %37, %44, %45, %46, %47 in 0 : vector<8x256xf32>, vector<8x256xf32>, vector<8x256xf32>, vector<8x256xf32>, vector<8x256xf32>, vector<8x256xf32>, vector<8x256xf32>, vector<8x256xf32>, vector<8x256xf32> -> vector<72x256xf32>
    %c0_38 = arith.constant 0 : index
    %c0_39 = arith.constant 0 : index
    %49 = vector.load %arg3[%c0_38, %c0_39] : memref<72x256xf32, #tpu.memory_space<vmem>>, vector<72x256xf32>
    %50 = arith.mulf %48, %49 : vector<72x256xf32>
    %cst_40 = arith.constant dense<0.000000e+00> : vector<8x256xf32>
    %51 = tpu.matmul %39, %50, %cst_40 {dimension_numbers = #tpu.dot_dimension_numbers<[1], [0], [0], [1], [0, 0, 1, 1], [], []>} : vector<8x72xf32>, vector<72x256xf32>, vector<8x256xf32> -> vector<8x256xf32>
    %52 = vector.broadcast %18 : f32 to vector<8x256xf32>
    %53 = arith.mulf %52, %51 : vector<8x256xf32>
    %54 = arith.addf %17, %53 : vector<8x256xf32>
    %cst_41 = arith.constant 0.000000e+00 : f32
    %55 = arith.subf %cst_41, %0 : f32
    %56 = vector.broadcast %55 : f32 to vector<8x256xf32>
    %57 = arith.maximumf %56, %54 : vector<8x256xf32>
    %58 = vector.broadcast %0 : f32 to vector<8x256xf32>
    %59 = arith.minimumf %58, %57 : vector<8x256xf32>
    %c1 = arith.constant 1 : index
    %60 = memref.load %arg2[%c1] : memref<2xf32, #tpu.memory_space<smem>>
    %c1_42 = arith.constant 1 : index
    %c0_43 = arith.constant 0 : index
    %c0_44 = arith.constant 0 : index
    %61 = vector.load %arg10[%c1_42, %c0_43, %c0_44] : memref<2x8x72xf32, #tpu.memory_space<vmem>>, vector<1x8x72xf32>
    %62 = vector.shape_cast %61 : vector<1x8x72xf32> to vector<8x72xf32>
    %c17_i32_45 = arith.constant 17 : i32
    %63 = tpu.dynamic_rotate %59 by %c17_i32_45 dim 1 : vector<8x256xf32>, i32 -> vector<8x256xf32>
    %c16_i32_46 = arith.constant 16 : i32
    %64 = tpu.dynamic_rotate %59 by %c16_i32_46 dim 1 : vector<8x256xf32>, i32 -> vector<8x256xf32>
    %c15_i32_47 = arith.constant 15 : i32
    %65 = tpu.dynamic_rotate %59 by %c15_i32_47 dim 1 : vector<8x256xf32>, i32 -> vector<8x256xf32>
    %c1_i32_48 = arith.constant 1 : i32
    %66 = tpu.dynamic_rotate %59 by %c1_i32_48 dim 1 : vector<8x256xf32>, i32 -> vector<8x256xf32>
    %c255_i32_49 = arith.constant 255 : i32
    %67 = tpu.dynamic_rotate %59 by %c255_i32_49 dim 1 : vector<8x256xf32>, i32 -> vector<8x256xf32>
    %c241_i32_50 = arith.constant 241 : i32
    %68 = tpu.dynamic_rotate %59 by %c241_i32_50 dim 1 : vector<8x256xf32>, i32 -> vector<8x256xf32>
    %c240_i32_51 = arith.constant 240 : i32
    %69 = tpu.dynamic_rotate %59 by %c240_i32_51 dim 1 : vector<8x256xf32>, i32 -> vector<8x256xf32>
    %c239_i32_52 = arith.constant 239 : i32
    %70 = tpu.dynamic_rotate %59 by %c239_i32_52 dim 1 : vector<8x256xf32>, i32 -> vector<8x256xf32>
    %71 = tpu.concatenate %63, %64, %65, %66, %59, %67, %68, %69, %70 in 0 : vector<8x256xf32>, vector<8x256xf32>, vector<8x256xf32>, vector<8x256xf32>, vector<8x256xf32>, vector<8x256xf32>, vector<8x256xf32>, vector<8x256xf32>, vector<8x256xf32> -> vector<72x256xf32>
    %c0_53 = arith.constant 0 : index
    %c0_54 = arith.constant 0 : index
    %72 = vector.load %arg4[%c0_53, %c0_54] : memref<72x256xf32, #tpu.memory_space<vmem>>, vector<72x256xf32>
    %73 = arith.mulf %71, %72 : vector<72x256xf32>
    %cst_55 = arith.constant dense<0.000000e+00> : vector<8x256xf32>
    %74 = tpu.matmul %62, %73, %cst_55 {dimension_numbers = #tpu.dot_dimension_numbers<[1], [0], [0], [1], [0, 0, 1, 1], [], []>} : vector<8x72xf32>, vector<72x256xf32>, vector<8x256xf32> -> vector<8x256xf32>
    %75 = arith.subf %2, %74 : vector<8x256xf32>
    %cst_56 = arith.constant 0.000000e+00 : f32
    %cst_57 = arith.constant 1.000000e+00 : f32
    %76 = vector.broadcast %cst_56 : f32 to vector<8x256xf32>
    %77 = arith.maximumf %76, %75 : vector<8x256xf32>
    %78 = vector.broadcast %cst_57 : f32 to vector<8x256xf32>
    %79 = arith.minimumf %78, %77 : vector<8x256xf32>
    %c1_58 = arith.constant 1 : index
    %c0_59 = arith.constant 0 : index
    %c0_60 = arith.constant 0 : index
    %80 = vector.load %arg9[%c1_58, %c0_59, %c0_60] : memref<2x8x72xf32, #tpu.memory_space<vmem>>, vector<1x8x72xf32>
    %81 = vector.shape_cast %80 : vector<1x8x72xf32> to vector<8x72xf32>
    %c17_i32_61 = arith.constant 17 : i32
    %82 = tpu.dynamic_rotate %79 by %c17_i32_61 dim 1 : vector<8x256xf32>, i32 -> vector<8x256xf32>
    %c16_i32_62 = arith.constant 16 : i32
    %83 = tpu.dynamic_rotate %79 by %c16_i32_62 dim 1 : vector<8x256xf32>, i32 -> vector<8x256xf32>
    %c15_i32_63 = arith.constant 15 : i32
    %84 = tpu.dynamic_rotate %79 by %c15_i32_63 dim 1 : vector<8x256xf32>, i32 -> vector<8x256xf32>
    %c1_i32_64 = arith.constant 1 : i32
    %85 = tpu.dynamic_rotate %79 by %c1_i32_64 dim 1 : vector<8x256xf32>, i32 -> vector<8x256xf32>
    %c255_i32_65 = arith.constant 255 : i32
    %86 = tpu.dynamic_rotate %79 by %c255_i32_65 dim 1 : vector<8x256xf32>, i32 -> vector<8x256xf32>
    %c241_i32_66 = arith.constant 241 : i32
    %87 = tpu.dynamic_rotate %79 by %c241_i32_66 dim 1 : vector<8x256xf32>, i32 -> vector<8x256xf32>
    %c240_i32_67 = arith.constant 240 : i32
    %88 = tpu.dynamic_rotate %79 by %c240_i32_67 dim 1 : vector<8x256xf32>, i32 -> vector<8x256xf32>
    %c239_i32_68 = arith.constant 239 : i32
    %89 = tpu.dynamic_rotate %79 by %c239_i32_68 dim 1 : vector<8x256xf32>, i32 -> vector<8x256xf32>
    %90 = tpu.concatenate %82, %83, %84, %85, %79, %86, %87, %88, %89 in 0 : vector<8x256xf32>, vector<8x256xf32>, vector<8x256xf32>, vector<8x256xf32>, vector<8x256xf32>, vector<8x256xf32>, vector<8x256xf32>, vector<8x256xf32>, vector<8x256xf32> -> vector<72x256xf32>
    %c0_69 = arith.constant 0 : index
    %c0_70 = arith.constant 0 : index
    %91 = vector.load %arg3[%c0_69, %c0_70] : memref<72x256xf32, #tpu.memory_space<vmem>>, vector<72x256xf32>
    %92 = arith.mulf %90, %91 : vector<72x256xf32>
    %cst_71 = arith.constant dense<0.000000e+00> : vector<8x256xf32>
    %93 = tpu.matmul %81, %92, %cst_71 {dimension_numbers = #tpu.dot_dimension_numbers<[1], [0], [0], [1], [0, 0, 1, 1], [], []>} : vector<8x72xf32>, vector<72x256xf32>, vector<8x256xf32> -> vector<8x256xf32>
    %94 = vector.broadcast %60 : f32 to vector<8x256xf32>
    %95 = arith.mulf %94, %93 : vector<8x256xf32>
    %96 = arith.addf %59, %95 : vector<8x256xf32>
    %cst_72 = arith.constant 0.000000e+00 : f32
    %97 = arith.subf %cst_72, %0 : f32
    %98 = vector.broadcast %97 : f32 to vector<8x256xf32>
    %99 = arith.maximumf %98, %96 : vector<8x256xf32>
    %100 = vector.broadcast %0 : f32 to vector<8x256xf32>
    %101 = arith.minimumf %100, %99 : vector<8x256xf32>
    %c0_73 = arith.constant 0 : index
    %c0_74 = arith.constant 0 : index
    %102 = vector.load %arg8[%c0_73, %c0_74] : memref<8x72xf32, #tpu.memory_space<vmem>>, vector<8x72xf32>
    %c17_i32_75 = arith.constant 17 : i32
    %103 = tpu.dynamic_rotate %101 by %c17_i32_75 dim 1 : vector<8x256xf32>, i32 -> vector<8x256xf32>
    %c16_i32_76 = arith.constant 16 : i32
    %104 = tpu.dynamic_rotate %101 by %c16_i32_76 dim 1 : vector<8x256xf32>, i32 -> vector<8x256xf32>
    %c15_i32_77 = arith.constant 15 : i32
    %105 = tpu.dynamic_rotate %101 by %c15_i32_77 dim 1 : vector<8x256xf32>, i32 -> vector<8x256xf32>
    %c1_i32_78 = arith.constant 1 : i32
    %106 = tpu.dynamic_rotate %101 by %c1_i32_78 dim 1 : vector<8x256xf32>, i32 -> vector<8x256xf32>
    %c255_i32_79 = arith.constant 255 : i32
    %107 = tpu.dynamic_rotate %101 by %c255_i32_79 dim 1 : vector<8x256xf32>, i32 -> vector<8x256xf32>
    %c241_i32_80 = arith.constant 241 : i32
    %108 = tpu.dynamic_rotate %101 by %c241_i32_80 dim 1 : vector<8x256xf32>, i32 -> vector<8x256xf32>
    %c240_i32_81 = arith.constant 240 : i32
    %109 = tpu.dynamic_rotate %101 by %c240_i32_81 dim 1 : vector<8x256xf32>, i32 -> vector<8x256xf32>
    %c239_i32_82 = arith.constant 239 : i32
    %110 = tpu.dynamic_rotate %101 by %c239_i32_82 dim 1 : vector<8x256xf32>, i32 -> vector<8x256xf32>
    %111 = tpu.concatenate %103, %104, %105, %106, %101, %107, %108, %109, %110 in 0 : vector<8x256xf32>, vector<8x256xf32>, vector<8x256xf32>, vector<8x256xf32>, vector<8x256xf32>, vector<8x256xf32>, vector<8x256xf32>, vector<8x256xf32>, vector<8x256xf32> -> vector<72x256xf32>
    %c0_83 = arith.constant 0 : index
    %c0_84 = arith.constant 0 : index
    %112 = vector.load %arg4[%c0_83, %c0_84] : memref<72x256xf32, #tpu.memory_space<vmem>>, vector<72x256xf32>
    %113 = arith.mulf %111, %112 : vector<72x256xf32>
    %cst_85 = arith.constant dense<0.000000e+00> : vector<8x256xf32>
    %114 = tpu.matmul %102, %113, %cst_85 {dimension_numbers = #tpu.dot_dimension_numbers<[1], [0], [0], [1], [0, 0, 1, 1], [], []>} : vector<8x72xf32>, vector<72x256xf32>, vector<8x256xf32> -> vector<8x256xf32>
    %115 = arith.subf %2, %114 : vector<8x256xf32>
    %cst_86 = arith.constant 0.000000e+00 : f32
    %cst_87 = arith.constant 1.000000e+00 : f32
    %116 = vector.broadcast %cst_86 : f32 to vector<8x256xf32>
    %117 = arith.maximumf %116, %115 : vector<8x256xf32>
    %118 = vector.broadcast %cst_87 : f32 to vector<8x256xf32>
    %119 = arith.minimumf %118, %117 : vector<8x256xf32>
    %c0_88 = arith.constant 0 : index
    %c0_89 = arith.constant 0 : index
    %c0_90 = arith.constant 0 : index
    %120 = vector.load %arg11[%c0_88, %c0_89, %c0_90] : memref<1x8x256xf32, #tpu.memory_space<vmem>>, vector<1x8x256xf32>
    %121 = vector.shape_cast %120 : vector<1x8x256xf32> to vector<8x256xf32>
    %122 = vector.shape_cast %119 : vector<8x256xf32> to vector<1x8x256xf32>
    tpu.vector_store %arg11[%c0_88, %c0_89, %c0_90], %122 {strides = array<i32>} : memref<1x8x256xf32, #tpu.memory_space<vmem>>, vector<1x8x256xf32>,
    return
  }
  func.func @transform_0(%arg0: i32) -> i32 {
    %c0_i32 = arith.constant 0 : i32
    %c0_i32_0 = arith.constant 0 : i32
    return %c0_i32 : i32
  }
  func.func @transform_1(%arg0: i32) -> i32 {
    %c0_i32 = arith.constant 0 : i32
    %c0_i32_0 = arith.constant 0 : i32
    return %c0_i32 : i32
  }
  func.func @transform_2(%arg0: i32) -> (i32, i32) {
    %c0_i32 = arith.constant 0 : i32
    %c0_i32_0 = arith.constant 0 : i32
    %c0_i32_1 = arith.constant 0 : i32
    return %c0_i32, %c0_i32_0 : i32, i32
  }
  func.func @transform_3(%arg0: i32) -> (i32, i32) {
    %c0_i32 = arith.constant 0 : i32
    %c0_i32_0 = arith.constant 0 : i32
    %c0_i32_1 = arith.constant 0 : i32
    return %c0_i32, %c0_i32_0 : i32, i32
  }
  func.func @transform_4(%arg0: i32) -> (i32, i32, i32) {
    %c0_i32 = arith.constant 0 : i32
    %c0_i32_0 = arith.constant 0 : i32
    %c0_i32_1 = arith.constant 0 : i32
    return %arg0, %c0_i32, %c0_i32_0 : i32, i32, i32
  }
  func.func @transform_5(%arg0: i32) -> (i32, i32, i32) {
    %c0_i32 = arith.constant 0 : i32
    %c0_i32_0 = arith.constant 0 : i32
    %c0_i32_1 = arith.constant 0 : i32
    return %arg0, %c0_i32, %c0_i32_0 : i32, i32, i32
  }
  func.func @transform_6(%arg0: i32) -> (i32, i32) {
    %c0_i32 = arith.constant 0 : i32
    %c0_i32_0 = arith.constant 0 : i32
    %c0_i32_1 = arith.constant 0 : i32
    return %c0_i32, %c0_i32_0 : i32, i32
  }
  func.func @transform_7(%arg0: i32) -> (i32, i32) {
    %c0_i32 = arith.constant 0 : i32
    %c0_i32_0 = arith.constant 0 : i32
    %c0_i32_1 = arith.constant 0 : i32
    return %c0_i32, %c0_i32_0 : i32, i32
  }
  func.func @transform_8(%arg0: i32) -> (i32, i32, i32) {
    %c0_i32 = arith.constant 0 : i32
    %c0_i32_0 = arith.constant 0 : i32
    %c0_i32_1 = arith.constant 0 : i32
    %c0_i32_2 = arith.constant 0 : i32
    return %c0_i32, %c0_i32_0, %c0_i32_1 : i32, i32, i32
  }
  func.func @transform_9(%arg0: i32) -> (i32, i32, i32) {
    %c0_i32 = arith.constant 0 : i32
    %c0_i32_0 = arith.constant 0 : i32
    %c0_i32_1 = arith.constant 0 : i32
    %c0_i32_2 = arith.constant 0 : i32
    return %c0_i32, %c0_i32_0, %c0_i32_1 : i32, i32, i32
  }
  func.func @transform_10(%arg0: i32) -> (i32, i32, i32) {
    %c0_i32 = arith.constant 0 : i32
    %c0_i32_0 = arith.constant 0 : i32
    %c0_i32_1 = arith.constant 0 : i32
    return %arg0, %c0_i32, %c0_i32_0 : i32, i32, i32
  }
}

</mosaic_0001>

<bundles_post_ra>
// kernel: dfbnet_forward.2
= control target key start
LH: loop header
LB: loop body
LE: loop exit
PB: predicated region body
PF: predicated region fallthrough
CT: control target
= control target key end

     0   :  { %s801_s18 = smov 0   ;;  %s1124_s0 = inlined_call_operand.vmem [shape: f32[8,256], index: 0, kind: input, shape index: {}]   ;;  %s1125_s1 = inlined_call_operand.vmem [shape: f32[72,256], index: 1, kind: input, shape index: {}, may-alias: {1,2}]   ;;  %s1126_s2 = inlined_call_operand.vmem [shape: f32[72,256], index: 2, kind: input, shape index: {}, may-alias: {1,2}]   ;;  %s1127_s3 = inlined_call_operand.vmem [shape: f32[2,8,72], index: 3, kind: input, shape index: {}]   ;;  %s1128_s4 = inlined_call_operand.vmem [shape: f32[2,8,72], index: 4, kind: input, shape index: {}]   ;;  %s1129_s5 = inlined_call_operand.vmem [shape: f32[2,1,1], index: 5, kind: output, shape index: {}]  }
   0x1 LB: > { %s654_s19 = sadd.s32 4294967295, %s745_s18   ;;  %p658_p0 = scmp.ge.s32.totalorder %s745_s18, 1  ;;  %s745_s18 = sphi %s801_s18, %s15_s18  }
   0x2   : > { %p195_p1 = scmp.lt.s32.totalorder %s745_s18, 3 }
   0x4   : > { %p196_p2 = pnand %p658_p0, %p195_p1 }
   0x5   : > { %p224_p3 = scmp.lt.s32.totalorder (!%p196_p2), %s654_s19, 1  ;;  %s838_s9 = smov (!%p196_p2), 0  }
   0x6   : > { %199 = sbr.rel (%p196_p2) target bundleno = 811 (0x32b), region = 40 }
   0xb   : > { %v237_v0 = vld [vmem:[%s1124_s0] sm:$0xff]   ;;  %v238_v1 = vld [vmem:[%s1124_s0 + $0x8] sm:$0xff]   ;;  %s1133_s19 = smov (!%p224_p3, %s654_s19), 1  ;;  %v832_v4 = vmov 1.0  }
   0xc   : > { %s659_s24 = sshll.u32 %s1133_s19, 3  ;;  %s234_s27 = scalar_lea.vmem %s1129_s5, %s1133_s19 }
   0xd   : > { %s227_s30 = scalar_lea.vmem %s1127_s3, %s659_s24  ;;  %s231_s8 = scalar_lea.vmem %s1128_s4, %s659_s24 }
   0xe   : > { %v828_v2 = vld [vmem:[%s227_s30] sm:$0xff] }
   0xf   : > { %v830_v3 = vld [vmem:[%s231_s8] sm:$0xff] }
  0x10 LB: >> { %s763_s10 = smov 112   ;;  %s764_s11 = smov 111   ;;  %v255_v6 = vlaneseq  ;;  %v325_v11 = vld [vmem:[%s1125_s1 + $0x80] sm:$0xff]  ;;  %v326_v12 = vld [vmem:[%s1125_s1 + $0x88] sm:$0xff]  ;;  %v323_v19 = vld [vmem:[%s1125_s1 + $0x70] sm:$0xff]  ;;  %vm345_vm8 = vcmask 588800   ;;  %717 = vrcp.f32 %v749_v4  ;;  %vm546_vm9 = vweird.f32 %v749_v4  ;;  %s761_s9 = sphi %s838_s9, %s1131_s9   ;;  %v757_v0 = vphi %v237_v0, %v571_v0   ;;  %v753_v1 = vphi %v238_v1, %v572_v1   ;;  %v749_v4 = vphi %v832_v4, %v1130_v4  }
  0x11   : >> { %295 = vrot.lane.b32.xlu1 %v757_v0, %s763_s10  ;;  %302 = vrot.lane.b32.xlu0 %v757_v0, %s764_s11  ;;  %s765_s12 = smov 113   ;;  %s766_s13 = smov 127   ;;  %v324_v20 = vld [vmem:[%s1125_s1 + $0x78] sm:$0xff]  ;;  %v321_v25 = vld [vmem:[%s1125_s1 + $0x60] sm:$0xff] }
  0x12   : >> { %288 = vrot.lane.b32.xlu2 %v757_v0, %s765_s12  ;;  %s767_s14 = smov 1   ;;  %s768_s15 = smov 15   ;;  %v884_v9 = vand.u32 127, %v255_v6  ;;  %v322_v26 = vld [vmem:[%s1125_s1 + $0x68] sm:$0xff]  ;;  %v319_v32 = vld [vmem:[%s1125_s1 + $0x50] sm:$0xff]  ;;  %v320_v33 = vld [vmem:[%s1125_s1 + $0x58] sm:$0xff] }
  0x13   : >> { %s769_s16 = smov 16   ;;  %s770_s17 = smov 17   ;;  %v317_v34 = vld [vmem:[%s1125_s1 + $0x40] sm:$0xff]  ;;  %v318_v35 = vld [vmem:[%s1125_s1 + $0x48] sm:$0xff]  ;;  %v315_v44 = vld [vmem:[%s1125_s1 + $0x30] sm:$0xff] }
  0x14   : >> { %vm299_vm0 = vcmp.lt.s32.totalorder %v884_v9, 112  ;;  %vm306_vm1 = vcmp.lt.s32.totalorder %v884_v9, 111  ;;  %vm292_vm2 = vcmp.lt.s32.totalorder %v884_v9, 113  ;;  %vm285_vm3 = vcmp.lt.s32.totalorder %v884_v9, 127  ;;  %v316_v46 = vld [vmem:[%s1125_s1 + $0x38] sm:$0xff]  ;;  %v313_v47 = vld [vmem:[%s1125_s1 + $0x20] sm:$0xff] }
  0x15   : >> { %v335_v42 = vmul.f32 %v757_v0, %v317_v34  ;;  %v336_v43 = vmul.f32 %v753_v1, %v318_v35  ;;  %vm278_vm4 = vcmp.lt.s32.totalorder %v884_v9, 1  ;;  %vm271_vm5 = vcmp.lt.s32.totalorder %v884_v9, 15  ;;  %v314_v48 = vld [vmem:[%s1125_s1 + $0x28] sm:$0xff]  ;;  %v311_v59 = vld [vmem:[%s1125_s1 + $0x10] sm:$0xff]  ;;  %v312_v60 = vld [vmem:[%s1125_s1 + $0x18] sm:$0xff]  ;;  %s575_s24 = sadd.s32 1, %s761_s9  }
  0x16   : >> { %vm264_vm6 = vcmp.lt.s32.totalorder %v884_v9, 16  ;;  %vm257_vm7 = vcmp.lt.s32.totalorder %v884_v9, 17  ;;  %v449_v35 = vld [vmem:[%s1126_s2 + $0x60] sm:$0xff]  ;;  %p245_p4 = scmp.lt.s32.totalorder %s575_s24, 300  ;;  %s1131_s9 = smov %s575_s24 }
  0x19   : >> { %297 = vrot.lane.b32.xlu1 %v753_v1, %s763_s10  ;;  %304 = vrot.lane.b32.xlu0 %v753_v1, %s764_s11 }
  0x1a   : >> { %290 = vrot.lane.b32.xlu2 %v753_v1, %s765_s12 }
  0x21   : >> { %283 = vrot.lane.b32.xlu1 %v753_v1, %s766_s13  ;;  %281 = vrot.lane.b32.xlu0 %v757_v0, %s766_s13 }
  0x22   : >> { %274 = vrot.lane.b32.xlu2 %v757_v0, %s767_s14 }
  0x29   : >> { %267 = vrot.lane.b32.xlu1 %v757_v0, %s768_s15  ;;  %276 = vrot.lane.b32.xlu0 %v753_v1, %s767_s14 }
  0x2a   : >> { %269 = vrot.lane.b32.xlu2 %v753_v1, %s768_s15 }
  0x31   : >> { %262 = vrot.lane.b32.xlu1 %v753_v1, %s769_s16  ;;  %260 = vrot.lane.b32.xlu0 %v757_v0, %s769_s16 }
  0x32   : >> { %251 = vrot.lane.b32.xlu2 %v757_v0, %s770_s17 }
  0x39   : >> { %253 = vrot.lane.b32.xlu0 %v753_v1, %s770_s17 }
  0x6c   : >> { %v289_v5 = vpop.permute.xlu2 %288 }
  0x74   : >> { %v291_v10 = vpop.permute.xlu2 %290 }
  0x75   : >> { %v293_v23 = vsel %vm292_vm2, %v289_v5, %v291_v10  ;;  %v294_v24 = vsel %vm292_vm2, %v291_v10, %v289_v5 }
  0x76   : >> { %v339_v30 = vmul.f32 %v321_v25, %v293_v23  ;;  %v340_v31 = vmul.f32 %v322_v26, %v294_v24 }
  0x7c   : >> { %v275_v29 = vpop.permute.xlu2 %274 }
  0x83   : >> { %v296_v7 = vpop.permute.xlu1 %295  ;;  %v303_v8 = vpop.permute.xlu0 %302 }
  0x84   : >> { %v270_v45 = vpop.permute.xlu2 %269 }
  0x8b   : >> { %v298_v13 = vpop.permute.xlu1 %297  ;;  %v305_v14 = vpop.permute.xlu0 %304 }
  0x8c   : >> { %v300_v15 = vsel %vm299_vm0, %v296_v7, %v298_v13  ;;  %v301_v16 = vsel %vm299_vm0, %v298_v13, %v296_v7  ;;  %v307_v17 = vsel %vm306_vm1, %v303_v8, %v305_v14  ;;  %v308_v18 = vsel %vm306_vm1, %v305_v14, %v303_v8  ;;  %v252_v6 = vpop.permute.xlu2 %251  ;;  %v309_v7 = vld [vmem:[%s1125_s1] sm:$0xff]  ;;  %v310_v8 = vld [vmem:[%s1125_s1 + $0x8] sm:$0xff] }
  0x8d   : >> { %v343_v21 = vmul.f32 %v325_v11, %v307_v17  ;;  %v344_v22 = vmul.f32 %v326_v12, %v308_v18  ;;  %v341_v27 = vmul.f32 %v323_v19, %v300_v15  ;;  %v342_v28 = vmul.f32 %v324_v20, %v301_v16  ;;  %v453_v18 = vld [vmem:[%s1126_s2 + $0x80] sm:$0xff]  ;;  %v454_v19 = vld [vmem:[%s1126_s2 + $0x88] sm:$0xff] }
  0x8f   : >> { %356 = vmatpush.msra.mxu0 %v343_v21  ;;  %376 = vmatpush.msra.mxu1 %v344_v22 }
  0x91   : >> { %357 = vmatpush.msra.mxu0 %v341_v27  ;;  %377 = vmatpush.msra.mxu1 %v342_v28  ;;  %v451_v27 = vld [vmem:[%s1126_s2 + $0x70] sm:$0xff]  ;;  %v452_v28 = vld [vmem:[%s1126_s2 + $0x78] sm:$0xff] }
  0x93   : >> { %v284_v36 = vpop.permute.xlu1 %283  ;;  %358 = vmatpush.msra.mxu0 %v339_v30  ;;  %378 = vmatpush.msra.mxu1 %v340_v31  ;;  %v282_v37 = vpop.permute.xlu0 %281 }
  0x94   : >> { %v286_v38 = vsel %vm285_vm3, %v282_v37, %v284_v36  ;;  %v287_v39 = vsel %vm285_vm3, %v284_v36, %v282_v37  ;;  %v450_v36 = vld [vmem:[%s1126_s2 + $0x68] sm:$0xff] }
  0x95   : >> { %v337_v40 = vmul.f32 %v319_v32, %v286_v38  ;;  %v338_v41 = vmul.f32 %v320_v33, %v287_v39 }
  0x97   : >> { %359 = vmatpush.msra.mxu0 %v337_v40  ;;  %379 = vmatpush.msra.mxu1 %v338_v41 }
  0x99   : >> { %360 = vmatpush.msra.mxu0 %v335_v42  ;;  %380 = vmatpush.msra.mxu1 %v336_v43  ;;  %v447_v42 = vld [vmem:[%s1126_s2 + $0x50] sm:$0xff]  ;;  %v448_v43 = vld [vmem:[%s1126_s2 + $0x58] sm:$0xff] }
  0x9b   : >> { %v268_v49 = vpop.permute.xlu1 %267  ;;  %v277_v50 = vpop.permute.xlu0 %276 }
  0x9c   : >> { %v279_v51 = vsel %vm278_vm4, %v275_v29, %v277_v50  ;;  %v280_v52 = vsel %vm278_vm4, %v277_v50, %v275_v29  ;;  %v272_v53 = vsel %vm271_vm5, %v268_v49, %v270_v45  ;;  %v273_v54 = vsel %vm271_vm5, %v270_v45, %v268_v49  ;;  %v446_v49 = vld [vmem:[%s1126_s2 + $0x48] sm:$0xff] }
  0x9d   : >> { %v333_v55 = vmul.f32 %v315_v44, %v280_v52  ;;  %v334_v56 = vmul.f32 %v316_v46, %v279_v51  ;;  %v331_v57 = vmul.f32 %v313_v47, %v273_v54  ;;  %v332_v58 = vmul.f32 %v314_v48, %v272_v53  ;;  %v445_v48 = vld [vmem:[%s1126_s2 + $0x40] sm:$0xff] }
  0x9f   : >> { %361 = vmatpush.msra.mxu0 %v333_v55  ;;  %381 = vmatpush.msra.mxu1 %v334_v56  ;;  %v443_v55 = vld [vmem:[%s1126_s2 + $0x30] sm:$0xff]  ;;  %v444_v56 = vld [vmem:[%s1126_s2 + $0x38] sm:$0xff] }
  0xa1   : >> { %362 = vmatpush.msra.mxu0 %v331_v57  ;;  %382 = vmatpush.msra.mxu1 %v332_v58 }
  0xa3   : >> { %v263_v61 = vpop.permute.xlu1 %262  ;;  %v261_v62 = vpop.permute.xlu0 %260 }
  0xa4   : >> { %v265_v63 = vsel %vm264_vm6, %v261_v62, %v263_v61  ;;  %v266_v0 = vsel %vm264_vm6, %v263_v61, %v261_v62 }
  0xa5   : >> { %v329_v1 = vmul.f32 %v311_v59, %v266_v0  ;;  %v330_v5 = vmul.f32 %v312_v60, %v265_v63  ;;  %v441_v63 = vld [vmem:[%s1126_s2 + $0x20] sm:$0xff]  ;;  %v442_v0 = vld [vmem:[%s1126_s2 + $0x28] sm:$0xff] }
  0xa7   : >> { %363 = vmatpush.msra.mxu0 %v329_v1  ;;  %383 = vmatpush.msra.mxu1 %v330_v5 }
  0xab   : >> { %v254_v10 = vpop.permute.xlu0 %253 }
  0xac   : >> { %v258_v11 = vsel %vm257_vm7, %v252_v6, %v254_v10  ;;  %v259_v12 = vsel %vm257_vm7, %v254_v10, %v252_v6  ;;  %v440_v10 = vld [vmem:[%s1126_s2 + $0x18] sm:$0xff] }
  0xad   : >> { %v327_v13 = vmul.f32 %v309_v7, %v259_v12  ;;  %v328_v14 = vmul.f32 %v310_v8, %v258_v11  ;;  %v439_v8 = vld [vmem:[%s1126_s2 + $0x10] sm:$0xff] }
  0xaf   : >> { %364 = vmatpush.msra.mxu0 %v327_v13  ;;  %384 = vmatpush.msra.mxu1 %v328_v14 }
  0xb0   : >> { %661 = vmatmul.msk.f32.vlgmr.msra.gmra.mxu0 %vm345_vm8, %v828_v2  ;;  %662 = vmatmul.msk.f32.vlgmr.msra.gmra.mxu1 %vm345_vm8, %v828_v2 }
 0x12d   : >> { %v366_v15 = vpop.f32.mrf.mxu0  ;;  %v386_v16 = vpop.f32.mrf.mxu1 }
 0x12e   : >> { %425 = vrot.lane.b32.xlu0 %v366_v15, %s763_s10  ;;  %431 = vrot.lane.b32.xlu1 %v366_v15, %s764_s11  ;;  %v463_v52 = vmul.f32 %v445_v48, %v366_v15  ;;  %v464_v53 = vmul.f32 %v446_v49, %v386_v16  ;;  %v550_v48 = vand.u32 2147483647, %v749_v4 }
 0x12f   : >> { %433 = vrot.lane.b32.xlu2 %v386_v16, %s764_s11 }
 0x130   : >> { %vm551_vm14 = vcmp.eq.f32.partialorder %v550_v48, 8.507059e+37 }
 0x136   : >> { %421 = vrot.lane.b32.xlu0 %v386_v16, %s765_s12  ;;  %427 = vrot.lane.b32.xlu1 %v386_v16, %s763_s10 }
 0x137   : >> { %419 = vrot.lane.b32.xlu2 %v366_v15, %s765_s12 }
 0x13e   : >> { %407 = vrot.lane.b32.xlu0 %v366_v15, %s767_s14  ;;  %413 = vrot.lane.b32.xlu1 %v366_v15, %s766_s13 }
 0x13f   : >> { %415 = vrot.lane.b32.xlu2 %v386_v16, %s766_s13 }
 0x146   : >> { %403 = vrot.lane.b32.xlu0 %v386_v16, %s768_s15  ;;  %409 = vrot.lane.b32.xlu1 %v386_v16, %s767_s14 }
 0x147   : >> { %401 = vrot.lane.b32.xlu2 %v366_v15, %s768_s15 }
 0x14e   : >> { %389 = vrot.lane.b32.xlu0 %v366_v15, %s770_s17  ;;  %395 = vrot.lane.b32.xlu1 %v366_v15, %s769_s16 }
 0x14f   : >> { %397 = vrot.lane.b32.xlu2 %v386_v16, %s769_s16 }
 0x156   : >> { %391 = vrot.lane.b32.xlu1 %v386_v16, %s770_s17 }
 0x189   : >> { %v434_v17 = vpop.permute.xlu2 %433 }
 0x191   : >> { %v420_v24 = vpop.permute.xlu2 %419 }
 0x199   : >> { %v416_v39 = vpop.permute.xlu2 %415 }
 0x1a0   : >> { %v426_v20 = vpop.permute.xlu0 %425  ;;  %v432_v21 = vpop.permute.xlu1 %431 }
 0x1a1   : >> { %v435_v22 = vsel %vm306_vm1, %v432_v21, %v434_v17  ;;  %v436_v23 = vsel %vm306_vm1, %v434_v17, %v432_v21  ;;  %v402_v54 = vpop.permute.xlu2 %401  ;;  %v437_v17 = vld [vmem:[%s1126_s2] sm:$0xff] }
 0x1a2   : >> { %v471_v25 = vmul.f32 %v453_v18, %v435_v22  ;;  %v472_v26 = vmul.f32 %v454_v19, %v436_v23  ;;  %v438_v18 = vld [vmem:[%s1126_s2 + $0x8] sm:$0xff] }
 0x1a4   : >> { %483 = vmatpush.msra.mxu2 %v471_v25  ;;  %503 = vmatpush.msra.mxu3 %v472_v26 }
 0x1a8   : >> { %v422_v29 = vpop.permute.xlu0 %421  ;;  %v428_v30 = vpop.permute.xlu1 %427 }
 0x1a9   : >> { %v423_v31 = vsel %vm292_vm2, %v420_v24, %v422_v29  ;;  %v424_v32 = vsel %vm292_vm2, %v422_v29, %v420_v24  ;;  %v429_v33 = vsel %vm299_vm0, %v426_v20, %v428_v30  ;;  %v430_v34 = vsel %vm299_vm0, %v428_v30, %v426_v20  ;;  %v398_v11 = vpop.permute.xlu2 %397 }
 0x1aa   : >> { %v469_v37 = vmul.f32 %v451_v27, %v429_v33  ;;  %v470_v38 = vmul.f32 %v452_v28, %v430_v34  ;;  %v467_v40 = vmul.f32 %v449_v35, %v423_v31  ;;  %v468_v41 = vmul.f32 %v450_v36, %v424_v32  ;;  %v718_v36 = vpop.eup %717 }
 0x1ab   : >> { %vm547_vm10 = vweird.f32 %v718_v36 }
 0x1ac   : >> { %484 = vmatpush.msra.mxu2 %v469_v37  ;;  %504 = vmatpush.msra.mxu3 %v470_v38  ;;  %v542_v37 = vmul.f32 %v749_v4, %v718_v36  ;;  %vm548_vm11 = vmor %vm546_vm9, %vm547_vm10 }
 0x1ae   : >> { %485 = vmatpush.msra.mxu2 %v467_v40  ;;  %505 = vmatpush.msra.mxu3 %v468_v41  ;;  %v543_v40 = vsub.f32 1.0, %v542_v37 }
 0x1b0   : >> { %v408_v44 = vpop.permute.xlu0 %407  ;;  %v414_v45 = vpop.permute.xlu1 %413 }
 0x1b1   : >> { %v417_v46 = vsel %vm285_vm3, %v414_v45, %v416_v39  ;;  %v418_v47 = vsel %vm285_vm3, %v416_v39, %v414_v45  ;;  %v552_v45 = vand.u32 2147483648, %v749_v4 }
 0x1b2   : >> { %v465_v50 = vmul.f32 %v447_v42, %v417_v46  ;;  %v466_v51 = vmul.f32 %v448_v43, %v418_v47  ;;  %v544_v43 = vmul.f32 %v718_v36, %v543_v40 }
 0x1b4   : >> { %486 = vmatpush.msra.mxu2 %v465_v50  ;;  %506 = vmatpush.msra.mxu3 %v466_v51  ;;  %v545_v47 = vadd.f32 %v718_v36, %v544_v43  ;;  %v553_v51 = vor.u32 1.1754944e-38, %v552_v45 }
 0x1b6   : >> { %487 = vmatpush.msra.mxu2 %v463_v52  ;;  %507 = vmatpush.msra.mxu3 %v464_v53  ;;  %v549_v53 = vsel %vm548_vm11, %v718_v36, %v545_v47 }
 0x1b8   : >> { %v404_v57 = vpop.permute.xlu0 %403  ;;  %v410_v58 = vpop.permute.xlu1 %409 }
 0x1b9   : >> { %v405_v59 = vsel %vm271_vm5, %v402_v54, %v404_v57  ;;  %v406_v60 = vsel %vm271_vm5, %v404_v57, %v402_v54  ;;  %v411_v61 = vsel %vm278_vm4, %v408_v44, %v410_v58  ;;  %v412_v62 = vsel %vm278_vm4, %v410_v58, %v408_v44 }
 0x1ba   : >> { %v461_v1 = vmul.f32 %v443_v55, %v412_v62  ;;  %v462_v5 = vmul.f32 %v444_v56, %v411_v61  ;;  %v459_v6 = vmul.f32 %v441_v63, %v406_v60  ;;  %v460_v7 = vmul.f32 %v442_v0, %v405_v59 }
 0x1bb   : >> { %v554_v57 = vsel %vm551_vm14, %v553_v51, %v549_v53 }
 0x1bc   : >> { %488 = vmatpush.msra.mxu2 %v461_v1  ;;  %508 = vmatpush.msra.mxu3 %v462_v5 }
 0x1be   : >> { %489 = vmatpush.msra.mxu2 %v459_v6  ;;  %509 = vmatpush.msra.mxu3 %v460_v7 }
 0x1c0   : >> { %v396_v12 = vpop.permute.xlu1 %395  ;;  %v390_v19 = vpop.permute.xlu0 %389 }
 0x1c1   : >> { %v399_v13 = vsel %vm264_vm6, %v396_v12, %v398_v11  ;;  %v400_v14 = vsel %vm264_vm6, %v398_v11, %v396_v12 }
 0x1c2   : >> { %v457_v15 = vmul.f32 %v439_v8, %v400_v14  ;;  %v458_v16 = vmul.f32 %v440_v10, %v399_v13 }
 0x1c4   : >> { %490 = vmatpush.msra.mxu2 %v457_v15  ;;  %510 = vmatpush.msra.mxu3 %v458_v16 }
 0x1c8   : >> { %v392_v20 = vpop.permute.xlu1 %391 }
 0x1c9   : >> { %v393_v21 = vsel %vm257_vm7, %v390_v19, %v392_v20  ;;  %v394_v22 = vsel %vm257_vm7, %v392_v20, %v390_v19 }
 0x1ca   : >> { %v455_v23 = vmul.f32 %v437_v17, %v394_v22  ;;  %v456_v24 = vmul.f32 %v438_v18, %v393_v21 }
 0x1cc   : >> { %491 = vmatpush.msra.mxu2 %v455_v23  ;;  %511 = vmatpush.msra.mxu3 %v456_v24 }
 0x1cd   : >> { %663 = vmatmul.msk.f32.vlgmr.msra.gmra.mxu2 %vm345_vm8, %v830_v3  ;;  %664 = vmatmul.msk.f32.vlgmr.msra.gmra.mxu3 %vm345_vm8, %v830_v3 }
 0x250   : >> { %v1092_v25 = vpop.f32.mrf.mxu2  ;;  %v513_v26 = vpop.f32.mrf.mxu3 }
 0x251   : >> { %v516_v27 = vmul.f32 %v1092_v25, %v1092_v25  ;;  %v517_v28 = vmul.f32 %v513_v26, %v513_v26 }
 0x253   : >> { %v518_v29 = vadd.f32 %v517_v28, %v516_v27 }
 0x255   : >> { %519 = vadd.xlane.f32.xlu2 %v518_v29 }
 0x2c8   : >> { %v520_v9 = vpop.xlane.xlu2 %519 }
 0x2c9   : >> { %v521_v30 = vrot.slane %v520_v9, 4 }
 0x2cb   : >> { %v522_v31 = vadd.f32 %v521_v30, %v520_v9 }
 0x2cd   : >> { %v523_v32 = vrot.slane %v522_v31, 2 }
 0x2cf   : >> { %v524_v33 = vadd.f32 %v523_v32, %v522_v31 }
 0x2d1   : >> { %v525_v34 = vrot.slane %v524_v33, 1 }
 0x2d3   : >> { %v526_v35 = vadd.f32 %v525_v34, %v524_v33 }
 0x2d5   : >> { %719 = vrsqrt.f32 %v526_v35  ;;  %vm534_vm12 = vcmp.eq.f32.partialorder %v526_v35, inf  ;;  %v537_v50 = vand.u32 2147483648, %v526_v35  ;;  %vm536_vm13 = vcmp.eq.f32.partialorder %v526_v35, 0.0 }
 0x2db   : >> { %v720_v38 = vpop.eup %719 }
 0x2dc   : >> { %v528_v39 = vmul.f32 %v720_v38, %v526_v35 }
 0x2de   : >> { %v529_v41 = vmul.f32 %v720_v38, %v528_v39 }
 0x2e0   : >> { %v530_v42 = vmul.f32 0.5, %v529_v41 }
 0x2e2   : >> { %v531_v44 = vsub.f32 1.5, %v530_v42 }
 0x2e4   : >> { %v532_v46 = vmul.f32 %v720_v38, %v531_v44 }
 0x2e6   : >> { %v533_v49 = vmul.f32 %v532_v46, %v526_v35 }
 0x2e8   : >> { %v535_v52 = vsel %vm534_vm12, %v526_v35, %v533_v49 }
 0x2e9   : >> { %v538_v54 = vsel %vm536_vm13, %v537_v50, %v535_v52  }
 0x2ea   : >> { %v539_v55 = vsub.f32 %v538_v54, %v749_v4  ;;  %v556_v56 = vmax.f32 %v538_v54, 1e-30 }
 0x2ec   : >> { %v540_v58 = vand.u32 2147483647, %v539_v55  ;;  %721 = vrcp.f32 %v556_v56  ;;  %v568_v63 = vand.u32 2147483648, %v556_v56  ;;  %v566_v1 = vand.u32 2147483647, %v556_v56 }
 0x2ed   : >> { %vm562_vm0 = vweird.f32 %v556_v56 }
 0x2ee   : >> { %v555_v59 = vmul.f32 %v554_v57, %v540_v58  ;;  %v569_v6 = vor.u32 1.1754944e-38, %v568_v63  ;;  %vm567_vm2 = vcmp.eq.f32.partialorder %v566_v1, 8.507059e+37 }
 0x2f0   : >> { %667 = vpush %v555_v59 }
 0x2f2   : >> { %v722_v60 = vpop.eup %721 }
 0x2f3   : >> { %v558_v61 = vmul.f32 %v722_v60, %v556_v56  ;;  %vm563_vm15 = vweird.f32 %v722_v60 }
 0x2f4   : >> { %vm564_vm1 = vmor %vm562_vm0, %vm563_vm15 }
 0x2f5   : >> { %v559_v62 = vsub.f32 1.0, %v558_v61 }
 0x2f7   : >> { %v560_v0 = vmul.f32 %v722_v60, %v559_v62 }
 0x2f9   : >> { %v561_v5 = vadd.f32 %v722_v60, %v560_v0 }
 0x2fb   : >> { %v565_v7 = vsel %vm564_vm1, %v722_v60, %v561_v5 }
 0x2fc   : >> { %v570_v4 = vsel %vm567_vm2, %v569_v6, %v565_v7 }
 0x2fd   : >> { %v571_v0 = vmul.f32 %v570_v4, %v1092_v25   ;;  %v572_v1 = vmul.f32 %v570_v4, %v513_v26   ;;  %v1130_v4 = vmov %v538_v54 }
 0x321   : >> { %s668_s25 = spop %667 }
 0x322   : >> { %p246_p5 = scmp.ge.f32.partialorder %s668_s25, 0.0001 }
 0x324   : >> { %p247_p6 = pnand %p246_p5, %p245_p4 }
 0x325   : > { %vm576_vm3 = vcmask (%p247_p6), 0  }
 0x326   : > { %250 = sbr.rel (!%p247_p6) target bundleno = 16 (0x10), region = 80  ;;  %577 = vst.msk [vmem:[%s234_s27] sm:$0x1] (%p247_p6), %vm576_vm3, %v538_v54 }
 0x32b PF: > { %s15_s18 = sadd.s32 1, %s745_s18  }
 0x32c   : > { %p12_p7 = scmp.ge.s32.totalorder %s15_s18, 4  }
 0x32e   :  { %14 = sbr.rel (!%p12_p7) target bundleno = 1 (0x1), region = 91 }

// kernel: dfbnet_forward.3
= control target key start
LH: loop header
LB: loop body
LE: loop exit
PB: predicated region body
PF: predicated region fallthrough
CT: control target
= control target key end

     0   :  { %s2121_s0 = inlined_call_operand.<no memory space> [shape: f32[1], index: 0, kind: input, shape index: {}]   ;;  %s2122_s1 = inlined_call_operand.vmem [shape: f32[2], index: 1, kind: input, shape index: {}]   ;;  %s2123_s2 = inlined_call_operand.vmem [shape: f32[72,256], index: 2, kind: input, shape index: {}, may-alias: {2,3}]   ;;  %s2124_s3 = inlined_call_operand.vmem [shape: f32[72,256], index: 3, kind: input, shape index: {}, may-alias: {2,3}]   ;;  %s2125_s4 = inlined_call_operand.vmem [shape: f32[2,8,256], index: 4, kind: input, shape index: {}]   ;;  %s2126_s5 = inlined_call_operand.vmem [shape: f32[2,8,256], index: 5, kind: input, shape index: {}]   ;;  %s2127_s6 = inlined_call_operand.vmem [shape: f32[8,72], index: 6, kind: input, shape index: {}]   ;;  %s2128_s7 = inlined_call_operand.vmem [shape: f32[8,72], index: 7, kind: input, shape index: {}]   ;;  %s2129_s8 = inlined_call_operand.vmem [shape: f32[2,8,72], index: 8, kind: input, shape index: {}]   ;;  %s2130_s9 = inlined_call_operand.vmem [shape: f32[2,8,72], index: 9, kind: input, shape index: {}]   ;;  %s2131_s10 = inlined_call_operand.vmem [shape: f32[2,8,256], index: 10, kind: output, shape index: {}]  }
   0x1   :  { %15 = sst [smem:[#allocation2]] %s2121_s0 }
   0x2   :  { %16 = vsyncpa [#allocation4], 0  ;;  %s1385_s15 = smov 0  }
   0x3 LB: > { %s1231_s16 = sadd.s32 4294967295, %s1316_s15   ;;  %p1233_p0 = scmp.ge.s32.totalorder %s1316_s15, 1  ;;  %s1316_s15 = sphi %s1385_s15, %s22_s15  }
   0x4   : > { %p273_p1 = scmp.lt.s32.totalorder %s1316_s15, 3  ;;  %s288_s19 = sshll.u32 %s2122_s1, 4  ;;  %s289_s19 = int_to_ptr.vmem [resolvable:$true] %s288_s19 }
   0x5   : > { %p1272_p3 = scmp.eq.s32.totalorder %s1231_s16, 0  ;;  %s1318_s0 = smov [#allocation3]  }
   0x6   : > { %p274_p2 = pnand %p1233_p0, %p273_p1 }
   0x8   : > { %p1268_p4 = pneg %p274_p2  ;;  %335 = sbr.rel (%p274_p2) target bundleno = 1777 (0x6f1), region = 60 }
   0xa   : > { %p1269_p5 = pnand %p1272_p3, %p1268_p4 }
   0xc   : > { %1271 = dma.vmem_to_smem (!%p1269_p5), %s289_s19, 16, %s1318_s0, [#allocation4]  }
   0xd   : > { %1311 = dma.done.wait (%p1272_p3), [#allocation4], 16  }
   0xe   : > { %1313 = vsyncadd (%p1272_p3), [#allocation4], 4294967280 }
   0xf   : > { %342 = sfence }
  0x10   : > { %p380_p6 = scmp.lt.s32.totalorder %s1231_s16, 1  ;;  %s1319_s24 = smov 112   ;;  %v405_v3 = vlaneseq  ;;  %v1445_v8 = vld [vmem:[%s2123_s2 + $0x80] sm:$0xff]  ;;  %v1450_v9 = vld [vmem:[%s2123_s2 + $0x88] sm:$0xff]  ;;  %v1464_v16 = vld [vmem:[%s2123_s2 + $0x70] sm:$0xff]  ;;  %vm495_vm8 = vcmask 588800  }
  0x11   : > { %s1320_s25 = smov 111   ;;  %s1321_s26 = smov 113   ;;  %v1469_v17 = vld [vmem:[%s2123_s2 + $0x78] sm:$0xff]  ;;  %v1480_v22 = vld [vmem:[%s2123_s2 + $0x60] sm:$0xff]  ;;  %v1485_v23 = vld [vmem:[%s2123_s2 + $0x68] sm:$0xff] }
  0x12   : > { %s2133_s16 = smov (!%p380_p6, %s1231_s16), 1  ;;  %s1322_s27 = smov 127   ;;  %v1438_v6 = vand.u32 127, %v405_v3  ;;  %v1495_v29 = vld [vmem:[%s2123_s2 + $0x50] sm:$0xff]  ;;  %v1500_v30 = vld [vmem:[%s2123_s2 + $0x58] sm:$0xff]  ;;  %v1505_v31 = vld [vmem:[%s2123_s2 + $0x40] sm:$0xff] }
  0x13   : > { %s1396_s20 = sshll.u32 %s2133_s16, 4  ;;  %s1323_s28 = smov 1   ;;  %v1510_v32 = vld [vmem:[%s2123_s2 + $0x48] sm:$0xff]  ;;  %v1526_v41 = vld [vmem:[%s2123_s2 + $0x30] sm:$0xff]  ;;  %v1532_v43 = vld [vmem:[%s2123_s2 + $0x38] sm:$0xff] }
  0x14   : > { %s389_s23 = scalar_lea.vmem %s2126_s5, %s1396_s20  ;;  %s1324_s29 = smov 15   ;;  %vm449_vm0 = vcmp.lt.s32.totalorder %v1438_v6, 112  ;;  %vm456_vm1 = vcmp.lt.s32.totalorder %v1438_v6, 111  ;;  %vm442_vm2 = vcmp.lt.s32.totalorder %v1438_v6, 113  ;;  %vm435_vm3 = vcmp.lt.s32.totalorder %v1438_v6, 127  ;;  %v1537_v44 = vld [vmem:[%s2123_s2 + $0x20] sm:$0xff] }
  0x15   : > { %v1402_v0 = vld [vmem:[%s389_s23] sm:$0xff]  ;;  %v1410_v1 = vld [vmem:[%s389_s23 + $0x8] sm:$0xff]  ;;  %s1325_s30 = smov 16   ;;  %s1326_s11 = smov 17   ;;  %vm428_vm4 = vcmp.lt.s32.totalorder %v1438_v6, 1  ;;  %vm421_vm5 = vcmp.lt.s32.totalorder %v1438_v6, 15 }
  0x16   : > { %445 = vrot.lane.b32.xlu1 %v1402_v0, %s1319_s24  ;;  %452 = vrot.lane.b32.xlu0 %v1402_v0, %s1320_s25  ;;  %v485_v39 = vmul.f32 %v1505_v31, %v1402_v0  ;;  %v486_v40 = vmul.f32 %v1510_v32, %v1410_v1  ;;  %v1542_v45 = vld [vmem:[%s2123_s2 + $0x28] sm:$0xff]  ;;  %vm414_vm6 = vcmp.lt.s32.totalorder %v1438_v6, 16  ;;  %v1560_v56 = vld [vmem:[%s2123_s2 + $0x10] sm:$0xff]  ;;  %vm407_vm7 = vcmp.lt.s32.totalorder %v1438_v6, 17  ;;  %s384_s13 = scalar_lea.vmem %s2125_s4, %s1396_s20  ;;  %s395_s17 = sld [smem:[#allocation2]] }
  0x17   : > { %438 = vrot.lane.b32.xlu2 %v1402_v0, %s1321_s26  ;;  %v1565_v57 = vld [vmem:[%s2123_s2 + $0x18] sm:$0xff]  ;;  %s539_s18 = sld [smem:[#allocation3]] }
  0x18   : > { %s1250_s12 = sld [smem:[#allocation3 + $0x1]] }
  0x1c   : > { %s789_s19 = ssub.f32 0.0, %s395_s17 }
  0x1e   : > { %447 = vrot.lane.b32.xlu1 %v1410_v1, %s1319_s24  ;;  %454 = vrot.lane.b32.xlu0 %v1410_v1, %s1320_s25 }
  0x1f   : > { %440 = vrot.lane.b32.xlu2 %v1410_v1, %s1321_s26 }
  0x26   : > { %433 = vrot.lane.b32.xlu1 %v1410_v1, %s1322_s27  ;;  %431 = vrot.lane.b32.xlu0 %v1402_v0, %s1322_s27 }
  0x27   : > { %424 = vrot.lane.b32.xlu2 %v1402_v0, %s1323_s28 }
  0x2e   : > { %417 = vrot.lane.b32.xlu1 %v1402_v0, %s1324_s29  ;;  %426 = vrot.lane.b32.xlu0 %v1410_v1, %s1323_s28 }
  0x2f   : > { %419 = vrot.lane.b32.xlu2 %v1410_v1, %s1324_s29 }
  0x36   : > { %412 = vrot.lane.b32.xlu1 %v1410_v1, %s1325_s30  ;;  %410 = vrot.lane.b32.xlu0 %v1402_v0, %s1325_s30 }
  0x37   : > { %401 = vrot.lane.b32.xlu2 %v1402_v0, %s1326_s11 }
  0x3e   : > { %403 = vrot.lane.b32.xlu0 %v1410_v1, %s1326_s11  ;;  %v1577_v1 = vld [vmem:[%s2123_s2] sm:$0xff] }
  0x71   : > { %v439_v2 = vpop.permute.xlu2 %438 }
  0x79   : > { %v441_v7 = vpop.permute.xlu2 %440 }
  0x7a   : > { %v443_v20 = vsel %vm442_vm2, %v439_v2, %v441_v7  ;;  %v444_v21 = vsel %vm442_vm2, %v441_v7, %v439_v2  ;;  %v1582_v2 = vld [vmem:[%s2123_s2 + $0x8] sm:$0xff] }
  0x7b   : > { %v489_v27 = vmul.f32 %v1480_v22, %v443_v20  ;;  %v490_v28 = vmul.f32 %v1485_v23, %v444_v21 }
  0x81   : > { %v425_v26 = vpop.permute.xlu2 %424 }
  0x88   : > { %v446_v4 = vpop.permute.xlu1 %445  ;;  %v453_v5 = vpop.permute.xlu0 %452 }
  0x89   : > { %v420_v42 = vpop.permute.xlu2 %419 }
  0x90   : > { %v448_v10 = vpop.permute.xlu1 %447  ;;  %v455_v11 = vpop.permute.xlu0 %454 }
  0x91   : > { %v450_v12 = vsel %vm449_vm0, %v446_v4, %v448_v10  ;;  %v451_v13 = vsel %vm449_vm0, %v448_v10, %v446_v4  ;;  %v457_v14 = vsel %vm456_vm1, %v453_v5, %v455_v11  ;;  %v458_v15 = vsel %vm456_vm1, %v455_v11, %v453_v5  ;;  %v402_v0 = vpop.permute.xlu2 %401  ;;  %v400_v11 = vld [vmem:[%s2127_s6] sm:$0xff] }
  0x92   : > { %v493_v18 = vmul.f32 %v1445_v8, %v457_v14  ;;  %v494_v19 = vmul.f32 %v1450_v9, %v458_v15  ;;  %v491_v24 = vmul.f32 %v1464_v16, %v450_v12  ;;  %v492_v25 = vmul.f32 %v1469_v17, %v451_v13 }
  0x94   : > { %506 = vmatpush.msra.mxu0 %v493_v18  ;;  %526 = vmatpush.msra.mxu1 %v494_v19  ;;  %v1634_v18 = vld [vmem:[%s2124_s3 + $0x80] sm:$0xff]  ;;  %v1639_v19 = vld [vmem:[%s2124_s3 + $0x88] sm:$0xff] }
  0x96   : > { %507 = vmatpush.msra.mxu0 %v491_v24  ;;  %527 = vmatpush.msra.mxu1 %v492_v25 }
  0x98   : > { %v434_v33 = vpop.permute.xlu1 %433  ;;  %508 = vmatpush.msra.mxu0 %v489_v27  ;;  %528 = vmatpush.msra.mxu1 %v490_v28  ;;  %v432_v34 = vpop.permute.xlu0 %431 }
  0x99   : > { %v436_v35 = vsel %vm435_vm3, %v432_v34, %v434_v33  ;;  %v437_v36 = vsel %vm435_vm3, %v434_v33, %v432_v34  ;;  %v1650_v33 = vld [vmem:[%s2124_s3 + $0x70] sm:$0xff]  ;;  %v1655_v34 = vld [vmem:[%s2124_s3 + $0x78] sm:$0xff] }
  0x9a   : > { %v487_v37 = vmul.f32 %v1495_v29, %v436_v35  ;;  %v488_v38 = vmul.f32 %v1500_v30, %v437_v36 }
  0x9c   : > { %509 = vmatpush.msra.mxu0 %v487_v37  ;;  %529 = vmatpush.msra.mxu1 %v488_v38 }
  0x9e   : > { %510 = vmatpush.msra.mxu0 %v485_v39  ;;  %530 = vmatpush.msra.mxu1 %v486_v40  ;;  %v1668_v40 = vld [vmem:[%s2124_s3 + $0x60] sm:$0xff] }
  0xa0   : > { %v418_v46 = vpop.permute.xlu1 %417  ;;  %v427_v47 = vpop.permute.xlu0 %426 }
  0xa1   : > { %v429_v48 = vsel %vm428_vm4, %v425_v26, %v427_v47  ;;  %v430_v49 = vsel %vm428_vm4, %v427_v47, %v425_v26  ;;  %v422_v50 = vsel %vm421_vm5, %v418_v46, %v420_v42  ;;  %v423_v51 = vsel %vm421_vm5, %v420_v42, %v418_v46  ;;  %v1673_v42 = vld [vmem:[%s2124_s3 + $0x68] sm:$0xff] }
  0xa2   : > { %v483_v52 = vmul.f32 %v1526_v41, %v430_v49  ;;  %v484_v53 = vmul.f32 %v1532_v43, %v429_v48  ;;  %v481_v54 = vmul.f32 %v1537_v44, %v423_v51  ;;  %v482_v55 = vmul.f32 %v1542_v45, %v422_v50 }
  0xa4   : > { %511 = vmatpush.msra.mxu0 %v483_v52  ;;  %531 = vmatpush.msra.mxu1 %v484_v53  ;;  %v1682_v52 = vld [vmem:[%s2124_s3 + $0x50] sm:$0xff]  ;;  %v1687_v53 = vld [vmem:[%s2124_s3 + $0x58] sm:$0xff] }
  0xa6   : > { %512 = vmatpush.msra.mxu0 %v481_v54  ;;  %532 = vmatpush.msra.mxu1 %v482_v55 }
  0xa8   : > { %v413_v58 = vpop.permute.xlu1 %412  ;;  %v411_v59 = vpop.permute.xlu0 %410 }
  0xa9   : > { %v415_v60 = vsel %vm414_vm6, %v411_v59, %v413_v58  ;;  %v416_v61 = vsel %vm414_vm6, %v413_v58, %v411_v59  ;;  %v1696_v59 = vld [vmem:[%s2124_s3 + $0x40] sm:$0xff] }
  0xaa   : > { %v479_v62 = vmul.f32 %v1560_v56, %v416_v61  ;;  %v480_v63 = vmul.f32 %v1565_v57, %v415_v60  ;;  %v1701_v60 = vld [vmem:[%s2124_s3 + $0x48] sm:$0xff] }
  0xac   : > { %513 = vmatpush.msra.mxu0 %v479_v62  ;;  %533 = vmatpush.msra.mxu1 %v480_v63 }
  0xb0   : > { %v404_v3 = vpop.permute.xlu0 %403 }
  0xb1   : > { %v408_v4 = vsel %vm407_vm7, %v402_v0, %v404_v3  ;;  %v409_v5 = vsel %vm407_vm7, %v404_v3, %v402_v0 }
  0xb2   : > { %v477_v7 = vmul.f32 %v1577_v1, %v409_v5  ;;  %v478_v10 = vmul.f32 %v1582_v2, %v408_v4  ;;  %v1712_v5 = vld [vmem:[%s2124_s3 + $0x30] sm:$0xff] }
  0xb4   : > { %514 = vmatpush.msra.mxu0 %v477_v7  ;;  %534 = vmatpush.msra.mxu1 %v478_v10  ;;  %v1717_v7 = vld [vmem:[%s2124_s3 + $0x38] sm:$0xff] }
  0xb5   : > { %1244 = vmatmul.msk.f32.vlgmr.msra.gmra.mxu0 %vm495_vm8, %v400_v11  ;;  %1245 = vmatmul.msk.f32.vlgmr.msra.gmra.mxu1 %vm495_vm8, %v400_v11 }
 0x132   : > { %v1595_v12 = vpop.f32.mrf.mxu0  ;;  %v1597_v13 = vpop.f32.mrf.mxu1 }
 0x133   : > { %585 = vrot.lane.b32.xlu2 %v1597_v13, %s1320_s25  ;;  %577 = vrot.lane.b32.xlu0 %v1595_v12, %s1319_s24  ;;  %v615_v63 = vmul.f32 %v1696_v59, %v1595_v12  ;;  %v616_v0 = vmul.f32 %v1701_v60, %v1597_v13 }
 0x134   : > { %583 = vrot.lane.b32.xlu1 %v1595_v12, %s1320_s25 }
 0x13b   : > { %571 = vrot.lane.b32.xlu2 %v1595_v12, %s1321_s26  ;;  %573 = vrot.lane.b32.xlu0 %v1597_v13, %s1321_s26 }
 0x13c   : > { %579 = vrot.lane.b32.xlu1 %v1597_v13, %s1319_s24 }
 0x143   : > { %567 = vrot.lane.b32.xlu2 %v1597_v13, %s1322_s27  ;;  %559 = vrot.lane.b32.xlu0 %v1595_v12, %s1323_s28 }
 0x144   : > { %565 = vrot.lane.b32.xlu1 %v1595_v12, %s1322_s27 }
 0x14b   : > { %553 = vrot.lane.b32.xlu2 %v1595_v12, %s1324_s29  ;;  %555 = vrot.lane.b32.xlu0 %v1597_v13, %s1324_s29 }
 0x14c   : > { %561 = vrot.lane.b32.xlu1 %v1597_v13, %s1323_s28 }
 0x153   : > { %549 = vrot.lane.b32.xlu2 %v1597_v13, %s1325_s30  ;;  %541 = vrot.lane.b32.xlu0 %v1595_v12, %s1326_s11 }
 0x154   : > { %547 = vrot.lane.b32.xlu1 %v1595_v12, %s1325_s30 }
 0x15c   : > { %543 = vrot.lane.b32.xlu1 %v1597_v13, %s1326_s11 }
 0x18d   : > { %v586_v14 = vpop.permute.xlu2 %585 }
 0x195   : > { %v572_v25 = vpop.permute.xlu2 %571 }
 0x19d   : > { %v568_v48 = vpop.permute.xlu2 %567 }
 0x1a5   : > { %v578_v15 = vpop.permute.xlu0 %577  ;;  %v554_v3 = vpop.permute.xlu2 %553 }
 0x1a6   : > { %v584_v20 = vpop.permute.xlu1 %583 }
 0x1a7   : > { %v587_v21 = vsel %vm456_vm1, %v584_v20, %v586_v14  ;;  %v588_v24 = vsel %vm456_vm1, %v586_v14, %v584_v20 }
 0x1a8   : > { %v623_v26 = vmul.f32 %v1634_v18, %v587_v21  ;;  %v624_v27 = vmul.f32 %v1639_v19, %v588_v24  ;;  %v1730_v21 = vld [vmem:[%s2124_s3 + $0x20] sm:$0xff]  ;;  %v1735_v24 = vld [vmem:[%s2124_s3 + $0x28] sm:$0xff] }
 0x1aa   : > { %635 = vmatpush.msra.mxu2 %v623_v26  ;;  %655 = vmatpush.msra.mxu3 %v624_v27 }
 0x1ad   : > { %v574_v28 = vpop.permute.xlu0 %573 }
 0x1ae   : > { %v580_v35 = vpop.permute.xlu1 %579  ;;  %v575_v36 = vsel %vm442_vm2, %v572_v25, %v574_v28  ;;  %v576_v37 = vsel %vm442_vm2, %v574_v28, %v572_v25 }
 0x1af   : > { %v581_v38 = vsel %vm449_vm0, %v578_v15, %v580_v35  ;;  %v582_v39 = vsel %vm449_vm0, %v580_v35, %v578_v15  ;;  %v619_v49 = vmul.f32 %v1668_v40, %v575_v36  ;;  %v620_v50 = vmul.f32 %v1673_v42, %v576_v37  ;;  %v1744_v35 = vld [vmem:[%s2124_s3 + $0x10] sm:$0xff]  ;;  %v1749_v36 = vld [vmem:[%s2124_s3 + $0x18] sm:$0xff]  ;;  %v550_v37 = vpop.permute.xlu2 %549 }
 0x1b0   : > { %v621_v46 = vmul.f32 %v1650_v33, %v581_v38  ;;  %v622_v47 = vmul.f32 %v1655_v34, %v582_v39 }
 0x1b2   : > { %636 = vmatpush.msra.mxu2 %v621_v46  ;;  %656 = vmatpush.msra.mxu3 %v622_v47 }
 0x1b4   : > { %637 = vmatpush.msra.mxu2 %v619_v49  ;;  %657 = vmatpush.msra.mxu3 %v620_v50  ;;  %v1760_v49 = vld [vmem:[%s2124_s3] sm:$0xff]  ;;  %v1765_v50 = vld [vmem:[%s2124_s3 + $0x8] sm:$0xff] }
 0x1b5   : > { %v560_v51 = vpop.permute.xlu0 %559 }
 0x1b6   : > { %v566_v54 = vpop.permute.xlu1 %565 }
 0x1b7   : > { %v569_v55 = vsel %vm435_vm3, %v566_v54, %v568_v48  ;;  %v570_v58 = vsel %vm435_vm3, %v568_v48, %v566_v54 }
 0x1b8   : > { %v617_v61 = vmul.f32 %v1682_v52, %v569_v55  ;;  %v618_v62 = vmul.f32 %v1687_v53, %v570_v58 }
 0x1ba   : > { %638 = vmatpush.msra.mxu2 %v617_v61  ;;  %658 = vmatpush.msra.mxu3 %v618_v62 }
 0x1bc   : > { %639 = vmatpush.msra.mxu2 %v615_v63  ;;  %659 = vmatpush.msra.mxu3 %v616_v0  ;;  %v540_v63 = vld [vmem:[%s2130_s9] sm:$0xff] }
 0x1bd   : > { %v556_v4 = vpop.permute.xlu0 %555  ;;  %v1782_v0 = vld [vmem:[%s384_s13] sm:$0xff] }
 0x1be   : > { %v562_v10 = vpop.permute.xlu1 %561  ;;  %v557_v11 = vsel %vm421_vm5, %v554_v3, %v556_v4  ;;  %v558_v14 = vsel %vm421_vm5, %v556_v4, %v554_v3  ;;  %v1784_v3 = vld [vmem:[%s384_s13 + $0x8] sm:$0xff] }
 0x1bf   : > { %v563_v15 = vsel %vm428_vm4, %v560_v51, %v562_v10  ;;  %v564_v20 = vsel %vm428_vm4, %v562_v10, %v560_v51  ;;  %v611_v27 = vmul.f32 %v1730_v21, %v558_v14  ;;  %v612_v28 = vmul.f32 %v1735_v24, %v557_v11 }
 0x1c0   : > { %v613_v25 = vmul.f32 %v1712_v5, %v564_v20  ;;  %v614_v26 = vmul.f32 %v1717_v7, %v563_v15 }
 0x1c2   : > { %640 = vmatpush.msra.mxu2 %v613_v25  ;;  %660 = vmatpush.msra.mxu3 %v614_v26 }
 0x1c4   : > { %641 = vmatpush.msra.mxu2 %v611_v27  ;;  %661 = vmatpush.msra.mxu3 %v612_v28 }
 0x1c5   : > { %v542_v51 = vpop.permute.xlu0 %541 }
 0x1c6   : > { %v548_v38 = vpop.permute.xlu1 %547 }
 0x1c7   : > { %v551_v39 = vsel %vm414_vm6, %v548_v38, %v550_v37  ;;  %v552_v46 = vsel %vm414_vm6, %v550_v37, %v548_v38 }
 0x1c8   : > { %v609_v47 = vmul.f32 %v1744_v35, %v552_v46  ;;  %v610_v48 = vmul.f32 %v1749_v36, %v551_v39 }
 0x1ca   : > { %642 = vmatpush.msra.mxu2 %v609_v47  ;;  %662 = vmatpush.msra.mxu3 %v610_v48 }
 0x1ce   : > { %v544_v54 = vpop.permute.xlu1 %543 }
 0x1cf   : > { %v545_v55 = vsel %vm407_vm7, %v542_v51, %v544_v54  ;;  %v546_v58 = vsel %vm407_vm7, %v544_v54, %v542_v51 }
 0x1d0   : > { %v607_v61 = vmul.f32 %v1760_v49, %v546_v58  ;;  %v608_v62 = vmul.f32 %v1765_v50, %v545_v55 }
 0x1d2   : > { %643 = vmatpush.msra.mxu2 %v607_v61  ;;  %663 = vmatpush.msra.mxu3 %v608_v62 }
 0x1d3   : > { %1246 = vmatmul.msk.f32.vlgmr.msra.gmra.mxu2 %vm495_vm8, %v540_v63  ;;  %1247 = vmatmul.msk.f32.vlgmr.msra.gmra.mxu3 %vm495_vm8, %v540_v63 }
 0x256   : > { %v645_v4 = vpop.f32.mrf.mxu2  ;;  %v665_v10 = vpop.f32.mrf.mxu3 }
 0x257   : > { %v668_v11 = vsub.f32 %v1782_v0, %v645_v4  ;;  %v669_v14 = vsub.f32 %v1784_v3, %v665_v10 }
 0x259   : > { %v670_v15 = vmax.f32 %v668_v11, 0.0  ;;  %v671_v20 = vmax.f32 %v669_v14, 0.0 }
 0x25b   : > { %v672_v25 = vmin.f32 %v670_v15, 1.0  ;;  %v673_v26 = vmin.f32 %v671_v20, 1.0 }
 0x25d   : > { %719 = vrot.lane.b32.xlu0 %v673_v26, %s1320_s25  ;;  %711 = vrot.lane.b32.xlu1 %v672_v25, %s1319_s24 }
 0x25e   : > { %717 = vrot.lane.b32.xlu2 %v672_v25, %s1320_s25 }
 0x265   : > { %705 = vrot.lane.b32.xlu0 %v672_v25, %s1321_s26  ;;  %707 = vrot.lane.b32.xlu1 %v673_v26, %s1321_s26 }
 0x266   : > { %713 = vrot.lane.b32.xlu2 %v673_v26, %s1319_s24 }
 0x26d   : > { %701 = vrot.lane.b32.xlu0 %v673_v26, %s1322_s27  ;;  %693 = vrot.lane.b32.xlu1 %v672_v25, %s1323_s28 }
 0x26e   : > { %699 = vrot.lane.b32.xlu2 %v672_v25, %s1322_s27 }
 0x275   : > { %687 = vrot.lane.b32.xlu0 %v672_v25, %s1324_s29  ;;  %689 = vrot.lane.b32.xlu1 %v673_v26, %s1324_s29 }
 0x276   : > { %695 = vrot.lane.b32.xlu2 %v673_v26, %s1323_s28 }
 0x27d   : > { %683 = vrot.lane.b32.xlu0 %v673_v26, %s1325_s30  ;;  %675 = vrot.lane.b32.xlu1 %v672_v25, %s1326_s11 }
 0x27e   : > { %681 = vrot.lane.b32.xlu2 %v672_v25, %s1325_s30 }
 0x286   : > { %677 = vrot.lane.b32.xlu2 %v673_v26, %s1326_s11 }
 0x2b8   : > { %v718_v27 = vpop.permute.xlu2 %717 }
 0x2c0   : > { %v714_v28 = vpop.permute.xlu2 %713 }
 0x2c8   : > { %v700_v39 = vpop.permute.xlu2 %699 }
 0x2cf   : > { %v720_v37 = vpop.permute.xlu0 %719  ;;  %v712_v38 = vpop.permute.xlu1 %711 }
 0x2d0   : > { %v721_v46 = vsel %vm456_vm1, %v718_v27, %v720_v37  ;;  %v722_v47 = vsel %vm456_vm1, %v720_v37, %v718_v27  ;;  %v715_v48 = vsel %vm449_vm0, %v712_v38, %v714_v28  ;;  %v716_v51 = vsel %vm449_vm0, %v714_v28, %v712_v38  ;;  %v696_v15 = vpop.permute.xlu2 %695 }
 0x2d1   : > { %v739_v54 = vmul.f32 %v721_v46, %v1445_v8  ;;  %v740_v55 = vmul.f32 %v722_v47, %v1450_v9  ;;  %v737_v58 = vmul.f32 %v715_v48, %v1464_v16  ;;  %v738_v61 = vmul.f32 %v716_v51, %v1469_v17 }
 0x2d2   : > { %v731_v51 = vmul.f32 %v672_v25, %v1505_v31 }
 0x2d3   : > { %751 = vmatpush.msrb.mxu0 %v739_v54  ;;  %771 = vmatpush.msrb.mxu1 %v740_v55  ;;  %v732_v54 = vmul.f32 %v673_v26, %v1510_v32 }
 0x2d5   : > { %752 = vmatpush.msrb.mxu0 %v737_v58  ;;  %772 = vmatpush.msrb.mxu1 %v738_v61 }
 0x2d7   : > { %v706_v62 = vpop.permute.xlu0 %705  ;;  %v708_v63 = vpop.permute.xlu1 %707 }
 0x2d8   : > { %v709_v4 = vsel %vm442_vm2, %v706_v62, %v708_v63  ;;  %v710_v10 = vsel %vm442_vm2, %v708_v63, %v706_v62  ;;  %v682_v55 = vpop.permute.xlu2 %681 }
 0x2d9   : > { %v735_v11 = vmul.f32 %v709_v4, %v1480_v22  ;;  %v736_v14 = vmul.f32 %v710_v10, %v1485_v23 }
 0x2db   : > { %753 = vmatpush.msrb.mxu0 %v735_v11  ;;  %773 = vmatpush.msrb.mxu1 %v736_v14 }
 0x2df   : > { %v702_v20 = vpop.permute.xlu0 %701  ;;  %v694_v27 = vpop.permute.xlu1 %693 }
 0x2e0   : > { %v703_v28 = vsel %vm435_vm3, %v700_v39, %v702_v20  ;;  %v704_v37 = vsel %vm435_vm3, %v702_v20, %v700_v39  ;;  %v697_v47 = vsel %vm428_vm4, %v694_v27, %v696_v15  ;;  %v698_v48 = vsel %vm428_vm4, %v696_v15, %v694_v27  ;;  %v678_v10 = vpop.permute.xlu2 %677 }
 0x2e1   : > { %v733_v38 = vmul.f32 %v703_v28, %v1495_v29  ;;  %v734_v46 = vmul.f32 %v704_v37, %v1500_v30  ;;  %v729_v39 = vmul.f32 %v698_v48, %v1526_v41  ;;  %v730_v58 = vmul.f32 %v697_v47, %v1532_v43  ;;  %v674_v48 = vld [vmem:[%s2129_s8] sm:$0xff] }
 0x2e3   : > { %754 = vmatpush.msrb.mxu0 %v733_v38  ;;  %774 = vmatpush.msrb.mxu1 %v734_v46 }
 0x2e5   : > { %755 = vmatpush.msrb.mxu0 %v731_v51  ;;  %775 = vmatpush.msrb.mxu1 %v732_v54  ;;  %v784_v51 = vstv %s539_s18 }
 0x2e7   : > { %v688_v61 = vpop.permute.xlu0 %687  ;;  %v690_v62 = vpop.permute.xlu1 %689  ;;  %756 = vmatpush.msrb.mxu0 %v729_v39  ;;  %776 = vmatpush.msrb.mxu1 %v730_v58 }
 0x2e8   : > { %v691_v63 = vsel %vm421_vm5, %v688_v61, %v690_v62  ;;  %v692_v4 = vsel %vm421_vm5, %v690_v62, %v688_v61  ;;  %v1859_v61 = vstv %s789_s19 }
 0x2e9   : > { %v727_v25 = vmul.f32 %v692_v4, %v1537_v44  ;;  %v728_v26 = vmul.f32 %v691_v63, %v1542_v45  ;;  %v1863_v4 = vstv %s395_s17 }
 0x2eb   : > { %757 = vmatpush.msrb.mxu0 %v727_v25  ;;  %777 = vmatpush.msrb.mxu1 %v728_v26 }
 0x2ef   : > { %v684_v11 = vpop.permute.xlu0 %683  ;;  %v676_v14 = vpop.permute.xlu1 %675 }
 0x2f0   : > { %v685_v15 = vsel %vm414_vm6, %v682_v55, %v684_v11  ;;  %v686_v20 = vsel %vm414_vm6, %v684_v11, %v682_v55  ;;  %v679_v27 = vsel %vm407_vm7, %v676_v14, %v678_v10  ;;  %v680_v28 = vsel %vm407_vm7, %v678_v10, %v676_v14 }
 0x2f1   : > { %v725_v37 = vmul.f32 %v686_v20, %v1560_v56  ;;  %v726_v38 = vmul.f32 %v685_v15, %v1565_v57  ;;  %v723_v46 = vmul.f32 %v680_v28, %v1577_v1  ;;  %v724_v47 = vmul.f32 %v679_v27, %v1582_v2 }
 0x2f3   : > { %758 = vmatpush.msrb.mxu0 %v725_v37  ;;  %778 = vmatpush.msrb.mxu1 %v726_v38 }
 0x2f5   : > { %759 = vmatpush.msrb.mxu0 %v723_v46  ;;  %779 = vmatpush.msrb.mxu1 %v724_v47 }
 0x2f6   : > { %1248 = vmatmul.msk.f32.vlgmr.msrb.gmra.mxu0 %vm495_vm8, %v674_v48  ;;  %1249 = vmatmul.msk.f32.vlgmr.msrb.gmra.mxu1 %vm495_vm8, %v674_v48 }
 0x373   : > { %v761_v54 = vpop.f32.mrf.mxu0  ;;  %v781_v55 = vpop.f32.mrf.mxu1 }
 0x374   : > { %v785_v39 = vmul.f32 %v784_v51, %v761_v54  ;;  %v786_v58 = vmul.f32 %v784_v51, %v781_v55 }
 0x376   : > { %v787_v62 = vadd.f32 %v785_v39, %v1595_v12  ;;  %v788_v63 = vadd.f32 %v786_v58, %v1597_v13 }
 0x378   : > { %v791_v25 = vmax.f32 %v1859_v61, %v787_v62  ;;  %v792_v26 = vmax.f32 %v1859_v61, %v788_v63 }
 0x37a   : > { %v1868_v10 = vmin.f32 %v1863_v4, %v791_v25  ;;  %v1871_v11 = vmin.f32 %v1863_v4, %v792_v26 }
 0x37c   : > { %843 = vrot.lane.b32.xlu1 %v1871_v11, %s1320_s25  ;;  %835 = vrot.lane.b32.xlu2 %v1868_v10, %s1319_s24 }
 0x37d   : > { %841 = vrot.lane.b32.xlu0 %v1868_v10, %s1320_s25 }
 0x384   : > { %829 = vrot.lane.b32.xlu1 %v1868_v10, %s1321_s26  ;;  %831 = vrot.lane.b32.xlu2 %v1871_v11, %s1321_s26 }
 0x385   : > { %837 = vrot.lane.b32.xlu0 %v1871_v11, %s1319_s24 }
 0x38c   : > { %825 = vrot.lane.b32.xlu1 %v1871_v11, %s1322_s27  ;;  %817 = vrot.lane.b32.xlu2 %v1868_v10, %s1323_s28 }
 0x38d   : > { %823 = vrot.lane.b32.xlu0 %v1868_v10, %s1322_s27 }
 0x394   : > { %811 = vrot.lane.b32.xlu1 %v1868_v10, %s1324_s29  ;;  %813 = vrot.lane.b32.xlu2 %v1871_v11, %s1324_s29 }
 0x395   : > { %819 = vrot.lane.b32.xlu0 %v1871_v11, %s1323_s28 }
 0x39c   : > { %807 = vrot.lane.b32.xlu1 %v1871_v11, %s1325_s30  ;;  %799 = vrot.lane.b32.xlu2 %v1868_v10, %s1326_s11 }
 0x39d   : > { %805 = vrot.lane.b32.xlu0 %v1868_v10, %s1325_s30 }
 0x3a5   : > { %801 = vrot.lane.b32.xlu0 %v1871_v11, %s1326_s11 }
 0x3d6   : > { %v836_v12 = vpop.permute.xlu2 %835 }
 0x3de   : > { %v832_v37 = vpop.permute.xlu2 %831 }
 0x3e6   : > { %v818_v63 = vpop.permute.xlu2 %817 }
 0x3ee   : > { %v844_v13 = vpop.permute.xlu1 %843 }
 0x3ef   : > { %v842_v14 = vpop.permute.xlu0 %841 }
 0x3f0   : > { %v845_v15 = vsel %vm456_vm1, %v842_v14, %v844_v13  ;;  %v846_v20 = vsel %vm456_vm1, %v844_v13, %v842_v14 }
 0x3f1   : > { %v863_v27 = vmul.f32 %v845_v15, %v1634_v18  ;;  %v864_v28 = vmul.f32 %v846_v20, %v1639_v19  ;;  %v855_v20 = vmul.f32 %v1868_v10, %v1696_v59 }
 0x3f3   : > { %875 = vmatpush.msrb.mxu2 %v863_v27  ;;  %895 = vmatpush.msrb.mxu3 %v864_v28  ;;  %v856_v27 = vmul.f32 %v1871_v11, %v1701_v60 }
 0x3f6   : > { %v830_v38 = vpop.permute.xlu1 %829 }
 0x3f7   : > { %v838_v46 = vpop.permute.xlu0 %837  ;;  %v833_v47 = vsel %vm442_vm2, %v830_v38, %v832_v37  ;;  %v834_v48 = vsel %vm442_vm2, %v832_v37, %v830_v38  ;;  %v814_v37 = vpop.permute.xlu2 %813 }
 0x3f8   : > { %v839_v51 = vsel %vm449_vm0, %v836_v12, %v838_v46  ;;  %v840_v54 = vsel %vm449_vm0, %v838_v46, %v836_v12  ;;  %v859_v58 = vmul.f32 %v833_v47, %v1668_v40  ;;  %v860_v62 = vmul.f32 %v834_v48, %v1673_v42 }
 0x3f9   : > { %v861_v55 = vmul.f32 %v839_v51, %v1650_v33  ;;  %v862_v39 = vmul.f32 %v840_v54, %v1655_v34 }
 0x3fb   : > { %876 = vmatpush.msrb.mxu2 %v861_v55  ;;  %896 = vmatpush.msrb.mxu3 %v862_v39 }
 0x3fd   : > { %877 = vmatpush.msrb.mxu2 %v859_v58  ;;  %897 = vmatpush.msrb.mxu3 %v860_v62 }
 0x3fe   : > { %v826_v25 = vpop.permute.xlu1 %825 }
 0x3ff   : > { %v824_v26 = vpop.permute.xlu0 %823 }
 0x400   : > { %v827_v13 = vsel %vm435_vm3, %v824_v26, %v826_v25  ;;  %v828_v12 = vsel %vm435_vm3, %v826_v25, %v824_v26 }
 0x401   : > { %v857_v14 = vmul.f32 %v827_v13, %v1682_v52  ;;  %v858_v15 = vmul.f32 %v828_v12, %v1687_v53 }
 0x403   : > { %878 = vmatpush.msrb.mxu2 %v857_v14  ;;  %898 = vmatpush.msrb.mxu3 %v858_v15  ;;  %v800_v14 = vpop.permute.xlu2 %799 }
 0x405   : > { %879 = vmatpush.msrb.mxu2 %v855_v20  ;;  %899 = vmatpush.msrb.mxu3 %v856_v27 }
 0x406   : > { %v812_v28 = vpop.permute.xlu1 %811 }
 0x407   : > { %v820_v38 = vpop.permute.xlu0 %819  ;;  %v815_v46 = vsel %vm421_vm5, %v812_v28, %v814_v37  ;;  %v816_v47 = vsel %vm421_vm5, %v814_v37, %v812_v28 }
 0x408   : > { %v821_v48 = vsel %vm428_vm4, %v818_v63, %v820_v38  ;;  %v822_v51 = vsel %vm428_vm4, %v820_v38, %v818_v63  ;;  %v851_v39 = vmul.f32 %v816_v47, %v1730_v21  ;;  %v852_v58 = vmul.f32 %v815_v46, %v1735_v24  ;;  %v1251_v38 = vld [vmem:[%s2130_s9 + $0x8] sm:$0xff] }
 0x409   : > { %v853_v54 = vmul.f32 %v822_v51, %v1712_v5  ;;  %v854_v55 = vmul.f32 %v821_v48, %v1717_v7 }
 0x40b   : > { %880 = vmatpush.msrb.mxu2 %v853_v54  ;;  %900 = vmatpush.msrb.mxu3 %v854_v55 }
 0x40d   : > { %881 = vmatpush.msrb.mxu2 %v851_v39  ;;  %901 = vmatpush.msrb.mxu3 %v852_v58 }
 0x40e   : > { %v808_v62 = vpop.permute.xlu1 %807 }
 0x40f   : > { %v806_v25 = vpop.permute.xlu0 %805 }
 0x410   : > { %v809_v26 = vsel %vm414_vm6, %v806_v25, %v808_v62  ;;  %v810_v63 = vsel %vm414_vm6, %v808_v62, %v806_v25 }
 0x411   : > { %v849_v13 = vmul.f32 %v810_v63, %v1744_v35  ;;  %v850_v12 = vmul.f32 %v809_v26, %v1749_v36 }
 0x413   : > { %882 = vmatpush.msrb.mxu2 %v849_v13  ;;  %902 = vmatpush.msrb.mxu3 %v850_v12 }
 0x417   : > { %v802_v15 = vpop.permute.xlu0 %801 }
 0x418   : > { %v803_v20 = vsel %vm407_vm7, %v800_v14, %v802_v15  ;;  %v804_v27 = vsel %vm407_vm7, %v802_v15, %v800_v14 }
 0x419   : > { %v847_v28 = vmul.f32 %v804_v27, %v1760_v49  ;;  %v848_v37 = vmul.f32 %v803_v20, %v1765_v50 }
 0x41b   : > { %883 = vmatpush.msrb.mxu2 %v847_v28  ;;  %903 = vmatpush.msrb.mxu3 %v848_v37 }
 0x41c   : > { %1252 = vmatmul.msk.f32.vlgmr.msrb.gmra.mxu2 %vm495_vm8, %v1251_v38  ;;  %1253 = vmatmul.msk.f32.vlgmr.msrb.gmra.mxu3 %vm495_vm8, %v1251_v38 }
 0x49f   : > { %v885_v46 = vpop.f32.mrf.mxu2  ;;  %v905_v47 = vpop.f32.mrf.mxu3 }
 0x4a0   : > { %v908_v48 = vsub.f32 %v1782_v0, %v885_v46  ;;  %v909_v51 = vsub.f32 %v1784_v3, %v905_v47 }
 0x4a2   : > { %v910_v54 = vmax.f32 %v908_v48, 0.0  ;;  %v911_v55 = vmax.f32 %v909_v51, 0.0 }
 0x4a4   : > { %v912_v39 = vmin.f32 %v910_v54, 1.0  ;;  %v913_v58 = vmin.f32 %v911_v55, 1.0 }
 0x4a6   : > { %960 = vrot.lane.b32.xlu2 %v913_v58, %s1320_s25  ;;  %952 = vrot.lane.b32.xlu0 %v912_v39, %s1319_s24 }
 0x4a7   : > { %958 = vrot.lane.b32.xlu1 %v912_v39, %s1320_s25 }
 0x4ae   : > { %946 = vrot.lane.b32.xlu2 %v912_v39, %s1321_s26  ;;  %948 = vrot.lane.b32.xlu0 %v913_v58, %s1321_s26 }
 0x4af   : > { %954 = vrot.lane.b32.xlu1 %v913_v58, %s1319_s24 }
 0x4b6   : > { %942 = vrot.lane.b32.xlu2 %v913_v58, %s1322_s27  ;;  %934 = vrot.lane.b32.xlu0 %v912_v39, %s1323_s28 }
 0x4b7   : > { %940 = vrot.lane.b32.xlu1 %v912_v39, %s1322_s27 }
 0x4be   : > { %928 = vrot.lane.b32.xlu2 %v912_v39, %s1324_s29  ;;  %930 = vrot.lane.b32.xlu0 %v913_v58, %s1324_s29 }
 0x4bf   : > { %936 = vrot.lane.b32.xlu1 %v913_v58, %s1323_s28 }
 0x4c6   : > { %924 = vrot.lane.b32.xlu2 %v913_v58, %s1325_s30  ;;  %916 = vrot.lane.b32.xlu0 %v912_v39, %s1326_s11 }
 0x4c7   : > { %922 = vrot.lane.b32.xlu1 %v912_v39, %s1325_s30 }
 0x4cf   : > { %918 = vrot.lane.b32.xlu1 %v913_v58, %s1326_s11 }
 0x500   : > { %v961_v62 = vpop.permute.xlu2 %960 }
 0x508   : > { %v947_v12 = vpop.permute.xlu2 %946 }
 0x510   : > { %v943_v47 = vpop.permute.xlu2 %942 }
 0x518   : > { %v953_v25 = vpop.permute.xlu0 %952 }
 0x519   : > { %v959_v26 = vpop.permute.xlu1 %958 }
 0x51a   : > { %v962_v63 = vsel %vm456_vm1, %v959_v26, %v961_v62  ;;  %v963_v13 = vsel %vm456_vm1, %v961_v62, %v959_v26  ;;  %v929_v26 = vpop.permute.xlu2 %928 }
 0x51b   : > { %v980_v14 = vmul.f32 %v962_v63, %v1445_v8  ;;  %v981_v15 = vmul.f32 %v963_v13, %v1450_v9 }
 0x51d   : > { %992 = vmatpush.msra.mxu0 %v980_v14  ;;  %1012 = vmatpush.msra.mxu1 %v981_v15 }
 0x520   : > { %v949_v20 = vpop.permute.xlu0 %948 }
 0x521   : > { %v955_v27 = vpop.permute.xlu1 %954  ;;  %v950_v28 = vsel %vm442_vm2, %v947_v12, %v949_v20  ;;  %v951_v37 = vsel %vm442_vm2, %v949_v20, %v947_v12 }
 0x522   : > { %v956_v38 = vsel %vm449_vm0, %v953_v25, %v955_v27  ;;  %v957_v46 = vsel %vm449_vm0, %v955_v27, %v953_v25  ;;  %v976_v48 = vmul.f32 %v950_v28, %v1480_v22  ;;  %v977_v51 = vmul.f32 %v951_v37, %v1485_v23  ;;  %v925_v15 = vpop.permute.xlu2 %924 }
 0x523   : > { %v978_v8 = vmul.f32 %v956_v38, %v1464_v16  ;;  %v979_v9 = vmul.f32 %v957_v46, %v1469_v17  ;;  %v972_v22 = vmul.f32 %v912_v39, %v1505_v31  ;;  %v973_v23 = vmul.f32 %v913_v58, %v1510_v32 }
 0x525   : > { %993 = vmatpush.msra.mxu0 %v978_v8  ;;  %1013 = vmatpush.msra.mxu1 %v979_v9 }
 0x527   : > { %994 = vmatpush.msra.mxu0 %v976_v48  ;;  %1014 = vmatpush.msra.mxu1 %v977_v51 }
 0x528   : > { %v935_v54 = vpop.permute.xlu0 %934 }
 0x529   : > { %v941_v55 = vpop.permute.xlu1 %940 }
 0x52a   : > { %v944_v62 = vsel %vm435_vm3, %v941_v55, %v943_v47  ;;  %v945_v25 = vsel %vm435_vm3, %v943_v47, %v941_v55 }
 0x52b   : > { %v974_v16 = vmul.f32 %v944_v62, %v1495_v29  ;;  %v975_v17 = vmul.f32 %v945_v25, %v1500_v30 }
 0x52d   : > { %995 = vmatpush.msra.mxu0 %v974_v16  ;;  %1015 = vmatpush.msra.mxu1 %v975_v17 }
 0x52f   : > { %996 = vmatpush.msra.mxu0 %v972_v22  ;;  %1016 = vmatpush.msra.mxu1 %v973_v23 }
 0x530   : > { %v931_v63 = vpop.permute.xlu0 %930 }
 0x531   : > { %v937_v13 = vpop.permute.xlu1 %936  ;;  %v932_v12 = vsel %vm421_vm5, %v929_v26, %v931_v63  ;;  %v933_v14 = vsel %vm421_vm5, %v931_v63, %v929_v26 }
 0x532   : > { %v938_v29 = vsel %vm428_vm4, %v935_v54, %v937_v13  ;;  %v939_v30 = vsel %vm428_vm4, %v937_v13, %v935_v54  ;;  %v968_v39 = vmul.f32 %v933_v14, %v1537_v44  ;;  %v969_v58 = vmul.f32 %v932_v12, %v1542_v45 }
 0x533   : > { %v970_v31 = vmul.f32 %v939_v30, %v1526_v41  ;;  %v971_v32 = vmul.f32 %v938_v29, %v1532_v43 }
 0x535   : > { %997 = vmatpush.msra.mxu0 %v970_v31  ;;  %1017 = vmatpush.msra.mxu1 %v971_v32 }
 0x537   : > { %998 = vmatpush.msra.mxu0 %v968_v39  ;;  %1018 = vmatpush.msra.mxu1 %v969_v58 }
 0x538   : > { %v917_v44 = vpop.permute.xlu0 %916 }
 0x539   : > { %v923_v20 = vpop.permute.xlu1 %922 }
 0x53a   : > { %v926_v27 = vsel %vm414_vm6, %v923_v20, %v925_v15  ;;  %v927_v28 = vsel %vm414_vm6, %v925_v15, %v923_v20 }
 0x53b   : > { %v966_v41 = vmul.f32 %v927_v28, %v1560_v56  ;;  %v967_v43 = vmul.f32 %v926_v27, %v1565_v57  ;;  %v1254_v56 = vld [vmem:[%s2129_s8 + $0x8] sm:$0xff]  ;;  %v1025_v57 = vstv %s1250_s12 }
 0x53d   : > { %999 = vmatpush.msra.mxu0 %v966_v41  ;;  %1019 = vmatpush.msra.mxu1 %v967_v43 }
 0x541   : > { %v919_v45 = vpop.permute.xlu1 %918 }
 0x542   : > { %v920_v37 = vsel %vm407_vm7, %v917_v44, %v919_v45  ;;  %v921_v38 = vsel %vm407_vm7, %v919_v45, %v917_v44 }
 0x543   : > { %v964_v46 = vmul.f32 %v921_v38, %v1577_v1  ;;  %v965_v8 = vmul.f32 %v920_v37, %v1582_v2 }
 0x545   : > { %1000 = vmatpush.msra.mxu0 %v964_v46  ;;  %1020 = vmatpush.msra.mxu1 %v965_v8 }
 0x546   : > { %1255 = vmatmul.msk.f32.vlgmr.msra.gmra.mxu0 %vm495_vm8, %v1254_v56  ;;  %1256 = vmatmul.msk.f32.vlgmr.msra.gmra.mxu1 %vm495_vm8, %v1254_v56 }
 0x5c3   : > { %v1002_v9 = vpop.f32.mrf.mxu0  ;;  %v1022_v47 = vpop.f32.mrf.mxu1 }
 0x5c4   : > { %v1026_v48 = vmul.f32 %v1025_v57, %v1002_v9  ;;  %v1027_v51 = vmul.f32 %v1025_v57, %v1022_v47 }
 0x5c6   : > { %v1028_v1 = vadd.f32 %v1026_v48, %v1868_v10  ;;  %v1029_v2 = vadd.f32 %v1027_v51, %v1871_v11  ;;  %v1034_v51 = vld [vmem:[%s2128_s7] sm:$0xff] }
 0x5c8   : > { %v1030_v54 = vmax.f32 %v1859_v61, %v1028_v1  ;;  %v1031_v55 = vmax.f32 %v1859_v61, %v1029_v2 }
 0x5ca   : > { %v1032_v62 = vmin.f32 %v1863_v4, %v1030_v54  ;;  %v1033_v25 = vmin.f32 %v1863_v4, %v1031_v55 }
 0x5cc   : > { %1079 = vrot.lane.b32.xlu0 %v1033_v25, %s1320_s25  ;;  %1071 = vrot.lane.b32.xlu1 %v1032_v62, %s1319_s24  ;;  %v1091_v28 = vmul.f32 %v1032_v62, %v1696_v59  ;;  %v1092_v41 = vmul.f32 %v1033_v25, %v1701_v60 }
 0x5cd   : > { %1077 = vrot.lane.b32.xlu2 %v1032_v62, %s1320_s25 }
 0x5d4   : > { %1065 = vrot.lane.b32.xlu0 %v1032_v62, %s1321_s26  ;;  %1067 = vrot.lane.b32.xlu1 %v1033_v25, %s1321_s26 }
 0x5d5   : > { %1073 = vrot.lane.b32.xlu2 %v1033_v25, %s1319_s24 }
 0x5dc   : > { %1061 = vrot.lane.b32.xlu0 %v1033_v25, %s1322_s27  ;;  %1053 = vrot.lane.b32.xlu1 %v1032_v62, %s1323_s28 }
 0x5dd   : > { %1059 = vrot.lane.b32.xlu2 %v1032_v62, %s1322_s27 }
 0x5e4   : > { %1047 = vrot.lane.b32.xlu0 %v1032_v62, %s1324_s29  ;;  %1049 = vrot.lane.b32.xlu1 %v1033_v25, %s1324_s29 }
 0x5e5   : > { %1055 = vrot.lane.b32.xlu2 %v1033_v25, %s1323_s28  ;;  %s394_s28 = scalar_lea.vmem %s2131_s10, %s1396_s20 }
 0x5ec   : > { %1043 = vrot.lane.b32.xlu0 %v1033_v25, %s1325_s30  ;;  %1035 = vrot.lane.b32.xlu1 %v1032_v62, %s1326_s11 }
 0x5ed   : > { %1041 = vrot.lane.b32.xlu2 %v1032_v62, %s1325_s30 }
 0x5f5   : > { %1037 = vrot.lane.b32.xlu2 %v1033_v25, %s1326_s11 }
 0x627   : > { %v1078_v61 = vpop.permute.xlu2 %1077 }
 0x62f   : > { %v1074_v4 = vpop.permute.xlu2 %1073 }
 0x637   : > { %v1060_v16 = vpop.permute.xlu2 %1059 }
 0x63e   : > { %v1080_v10 = vpop.permute.xlu0 %1079  ;;  %v1072_v11 = vpop.permute.xlu1 %1071 }
 0x63f   : > { %v1081_v17 = vsel %vm456_vm1, %v1078_v61, %v1080_v10  ;;  %v1082_v22 = vsel %vm456_vm1, %v1080_v10, %v1078_v61  ;;  %v1075_v23 = vsel %vm449_vm0, %v1072_v11, %v1074_v4  ;;  %v1076_v26 = vsel %vm449_vm0, %v1074_v4, %v1072_v11  ;;  %v1056_v39 = vpop.permute.xlu2 %1055 }
 0x640   : > { %v1099_v63 = vmul.f32 %v1081_v17, %v1634_v18  ;;  %v1100_v13 = vmul.f32 %v1082_v22, %v1639_v19  ;;  %v1097_v12 = vmul.f32 %v1075_v23, %v1650_v33  ;;  %v1098_v14 = vmul.f32 %v1076_v26, %v1655_v34 }
 0x642   : > { %1111 = vmatpush.msra.mxu2 %v1099_v63  ;;  %1131 = vmatpush.msra.mxu3 %v1100_v13 }
 0x644   : > { %1112 = vmatpush.msra.mxu2 %v1097_v12  ;;  %1132 = vmatpush.msra.mxu3 %v1098_v14 }
 0x646   : > { %v1066_v29 = vpop.permute.xlu0 %1065  ;;  %v1068_v30 = vpop.permute.xlu1 %1067 }
 0x647   : > { %v1069_v31 = vsel %vm442_vm2, %v1066_v29, %v1068_v30  ;;  %v1070_v32 = vsel %vm442_vm2, %v1068_v30, %v1066_v29  ;;  %v1042_v43 = vpop.permute.xlu2 %1041 }
 0x648   : > { %v1095_v18 = vmul.f32 %v1069_v31, %v1668_v40  ;;  %v1096_v19 = vmul.f32 %v1070_v32, %v1673_v42 }
 0x64a   : > { %1113 = vmatpush.msra.mxu2 %v1095_v18  ;;  %1133 = vmatpush.msra.mxu3 %v1096_v19 }
 0x64e   : > { %v1062_v33 = vpop.permute.xlu0 %1061  ;;  %v1054_v34 = vpop.permute.xlu1 %1053 }
 0x64f   : > { %v1063_v58 = vsel %vm435_vm3, %v1060_v16, %v1062_v33  ;;  %v1064_v15 = vsel %vm435_vm3, %v1062_v33, %v1060_v16  ;;  %v1057_v40 = vsel %vm428_vm4, %v1054_v34, %v1056_v39  ;;  %v1058_v42 = vsel %vm428_vm4, %v1056_v39, %v1054_v34 }
 0x650   : > { %v1093_v20 = vmul.f32 %v1063_v58, %v1682_v52  ;;  %v1094_v27 = vmul.f32 %v1064_v15, %v1687_v53  ;;  %v1089_v44 = vmul.f32 %v1058_v42, %v1712_v5  ;;  %v1090_v45 = vmul.f32 %v1057_v40, %v1717_v7  ;;  %v1038_v5 = vpop.permute.xlu2 %1037 }
 0x652   : > { %1114 = vmatpush.msra.mxu2 %v1093_v20  ;;  %1134 = vmatpush.msra.mxu3 %v1094_v27 }
 0x654   : > { %1115 = vmatpush.msra.mxu2 %v1091_v28  ;;  %1135 = vmatpush.msra.mxu3 %v1092_v41 }
 0x656   : > { %v1048_v52 = vpop.permute.xlu0 %1047  ;;  %v1050_v53 = vpop.permute.xlu1 %1049  ;;  %1116 = vmatpush.msra.mxu2 %v1089_v44  ;;  %1136 = vmatpush.msra.mxu3 %v1090_v45 }
 0x657   : > { %v1051_v37 = vsel %vm421_vm5, %v1048_v52, %v1050_v53  ;;  %v1052_v38 = vsel %vm421_vm5, %v1050_v53, %v1048_v52 }
 0x658   : > { %v1087_v59 = vmul.f32 %v1052_v38, %v1730_v21  ;;  %v1088_v60 = vmul.f32 %v1051_v37, %v1735_v24 }
 0x65a   : > { %1117 = vmatpush.msra.mxu2 %v1087_v59  ;;  %1137 = vmatpush.msra.mxu3 %v1088_v60 }
 0x65e   : > { %v1044_v7 = vpop.permute.xlu0 %1043  ;;  %v1036_v46 = vpop.permute.xlu1 %1035 }
 0x65f   : > { %v1045_v8 = vsel %vm414_vm6, %v1042_v43, %v1044_v7  ;;  %v1046_v56 = vsel %vm414_vm6, %v1044_v7, %v1042_v43  ;;  %v1039_v57 = vsel %vm407_vm7, %v1036_v46, %v1038_v5  ;;  %v1040_v9 = vsel %vm407_vm7, %v1038_v5, %v1036_v46 }
 0x660   : > { %v1085_v21 = vmul.f32 %v1046_v56, %v1744_v35  ;;  %v1086_v24 = vmul.f32 %v1045_v8, %v1749_v36  ;;  %v1083_v47 = vmul.f32 %v1040_v9, %v1760_v49  ;;  %v1084_v48 = vmul.f32 %v1039_v57, %v1765_v50 }
 0x662   : > { %1118 = vmatpush.msra.mxu2 %v1085_v21  ;;  %1138 = vmatpush.msra.mxu3 %v1086_v24 }
 0x664   : > { %1119 = vmatpush.msra.mxu2 %v1083_v47  ;;  %1139 = vmatpush.msra.mxu3 %v1084_v48 }
 0x665   : > { %1257 = vmatmul.msk.f32.vlgmr.msra.gmra.mxu2 %vm495_vm8, %v1034_v51  ;;  %1258 = vmatmul.msk.f32.vlgmr.msra.gmra.mxu3 %vm495_vm8, %v1034_v51 }
 0x6e8   : > { %v1121_v6 = vpop.f32.mrf.mxu2  ;;  %v1141_v35 = vpop.f32.mrf.mxu3 }
 0x6e9   : > { %v1144_v36 = vsub.f32 %v1782_v0, %v1121_v6  ;;  %v1145_v49 = vsub.f32 %v1784_v3, %v1141_v35 }
 0x6eb   : > { %v1146_v1 = vmax.f32 %v1144_v36, 0.0  ;;  %v1147_v50 = vmax.f32 %v1145_v49, 0.0 }
 0x6ed   : > { %v1148_v2 = vmin.f32 %v1146_v1, 1.0  ;;  %v1149_v54 = vmin.f32 %v1147_v50, 1.0 }
 0x6ef   : > { %1150 = vst [vmem:[%s394_s28] sm:$0xff] %v1148_v2 }
 0x6f0   : > { %1151 = vst [vmem:[%s394_s28 + $0x8] sm:$0xff] %v1149_v54 }
 0x6f1 PF: > { %s22_s15 = sadd.s32 1, %s1316_s15  }
 0x6f2   : > { %p19_p7 = scmp.ge.s32.totalorder %s22_s15, 4  }
 0x6f4   :  { %21 = sbr.rel (!%p19_p7) target bundleno = 3 (0x3), region = 100 }
 0x6f9   :  { %1173 = vsyncpa [#allocation4], 1 }
 0x6fa   :  { %1175 = vsyncpa [#allocation4 + $0x1], 1 }

</bundles_post_ra>
